<compile_context>
chip_gen: v6e
topology: v6e:2x2x1
jax: 0.10.0
libtpu: 0.0.40
codegen_flags: <defaults>
</compile_context>

<pallas_src>
import jax
import jax.numpy as jnp
from jax.experimental import pallas as pl
from jax.experimental.pallas import tpu as pltpu

H_BERT = 768      # BERT hidden size (fixed by nn.Linear(768, E) in the module)
E_DIM = 128       # args.entity_embedding_size
VOCAB = 512       # vocab_size of the entity-output nn.Embedding
TOK_VOCAB = 1000  # token vocab used only by the synthetic BERT stand-in


def _round_up(x, m):
    return ((x + m - 1) // m) * m


def net_kernel(enc_ref, wfc_ref, bfc_ref, outw_t_ref, logits_ref, yhat_ref, encp_ref):
    # enc_ref    : (TM, H)  f32    bert encodings row-tile (cast to bf16 in-kernel)
    # wfc_ref    : (H, E)   bf16   fc weight (input-major)
    # bfc_ref    : (1, E)   f32    fc bias
    # outw_t_ref : (E, V)   bf16   out.weight.transpose(0, 1)
    # bf16 MXU operands, f32 accumulation.
    enc_bf = enc_ref[...].astype(jnp.bfloat16)      # VPU cast, hidden under DMA/MXU slack
    proj = jnp.dot(enc_bf, wfc_ref[...], preferred_element_type=jnp.float32)
    proj = proj + bfc_ref[...]
    encp_ref[...] = proj

    logits = jnp.dot(proj.astype(jnp.bfloat16), outw_t_ref[...],
                     preferred_element_type=jnp.float32)
    logits_ref[...] = logits.astype(logits_ref.dtype)   # bf16 writeback: halves biggest stream

    # argmax over the vocab axis on the f32 accumulator (first occurrence, like torch).
    # Index row is (1, V) and broadcasts inside the where; no (TM, V) iota is materialized.
    V = logits.shape[-1]
    idx = jax.lax.broadcasted_iota(jnp.int32, (1, V), 1)
    maxv = jnp.max(logits, axis=-1, keepdims=True)
    yhat = jnp.min(jnp.where(logits == maxv, idx, V), axis=-1, keepdims=True)
    yhat_ref[...] = yhat.astype(jnp.int32)
    # TODO(synk): (TM, 1) yhat lowers to masked narrow stores; bytes are tiny, left as-is.


def _pick_tile_m(M, tile_m):
    # Row tile: multiple of 256 (or tight multiple of 8 for tiny problems), capped near the
    # problem size, and small enough that the grid has >= 2 steps whenever M allows so the
    # "parallel" row axis can shard across v7x's 2 TensorCores. Default 2048 fits v7x's
    # 64 MiB VMEM; only raise toward 4096 on v5e/v6e (128 MiB) with profiling.
    M = max(int(M), 1)
    if M <= 256:
        return _round_up(M, 8)
    tile_m = max(256, int(tile_m))
    tile_m = min(tile_m, _round_up(M, 256))
    if M > 512:
        tile_m = min(tile_m, _round_up(pl.cdiv(M, 2), 256))
    return max(256, _round_up(tile_m, 256))


def net_forward(enc_bert, w_fc, b_fc, out_weight, *, tile_m=2048):
    """enc_bert: (N, T, H) f32; w_fc: (H, E); b_fc: (E,); out_weight: (V, E)."""
    N, T, H = enc_bert.shape
    M = N * T
    E = w_fc.shape[1]
    V = out_weight.shape[0]

    tile_m = _pick_tile_m(M, tile_m)
    grid_m = pl.cdiv(M, tile_m)

    # No padding / output slicing: outputs are allocated at M rows; Pallas clips the last
    # partial block on writeback, so garbage rows of the tail tile never reach HBM.
    enc2d = enc_bert.reshape(M, H)                      # stays f32; cast happens in-kernel
    wfc_bf = w_fc.astype(jnp.bfloat16)
    outw_t_bf = out_weight.T.astype(jnp.bfloat16)       # matches out.weight.transpose(0, 1)
    b2d = b_fc.reshape(1, E).astype(jnp.float32)

    # Double-buffered streaming bytes per grid step (enc in + encp/logits/yhat out).
    stream_bytes = tile_m * (H * 4 + E * 4 + V * 2 + 4)
    vmem_limit = int(max(32 << 20, min(2 * stream_bytes + (8 << 20), 120 << 20)))
    cost = pl.CostEstimate(
        flops=2 * M * (H * E + E * V),
        transcendentals=0,
        bytes_accessed=M * (H * 4 + E * 4 + V * 2 + 4) + H * E * 2 + E * 4 + E * V * 2)

    def build(weight_mode):
        def const_spec(shape):
            # Constant index map: block never changes across the grid, Mosaic keeps the
            # weights resident and elides re-DMA.
            if weight_mode is None:
                return pl.BlockSpec(shape, lambda i: (0, 0))
            return pl.BlockSpec(shape, lambda i: (0, 0), pipeline_mode=weight_mode)

        return pl.pallas_call(
            net_kernel,
            out_shape=(
                jax.ShapeDtypeStruct((M, V), jnp.bfloat16),
                jax.ShapeDtypeStruct((M, 1), jnp.int32),
                jax.ShapeDtypeStruct((M, E), jnp.float32),
            ),
            grid_spec=pltpu.PrefetchScalarGridSpec(
                num_scalar_prefetch=0,
                grid=(grid_m,),
                in_specs=[
                    pl.BlockSpec((tile_m, H), lambda i: (i, 0)),
                    const_spec((H, E)),
                    const_spec((1, E)),
                    const_spec((E, V)),
                ],
                out_specs=[
                    pl.BlockSpec((tile_m, V), lambda i: (i, 0)),
                    pl.BlockSpec((tile_m, 1), lambda i: (i, 0)),
                    pl.BlockSpec((tile_m, E), lambda i: (i, 0)),
                ],
            ),
            compiler_params=pltpu.CompilerParams(
                dimension_semantics=("parallel",),
                vmem_limit_bytes=vmem_limit),
            cost_estimate=cost,
        )

    try:
        # Single-buffer the resident weight operands (tiny VMEM / bookkeeping saving).
        logits, yhat, encp = jax.block_until_ready(
            build(pl.Buffered(1))(enc2d, wfc_bf, b2d, outw_t_bf))
    except Exception:
        # Fallback: default double-buffering if Buffered(1) is rejected by this build.
        logits, yhat, encp = build(None)(enc2d, wfc_bf, b2d, outw_t_bf)

    # Mirrors forward(..., y=None): (logits, None, y_hat, None, None, enc)
    return (logits.reshape(N, T, V), None,
            yhat.reshape(N, T), None, None,
            encp.reshape(N, T, E))


def _reference(enc_bert, w_fc, b_fc, out_weight):
    # Plain-JAX reference with the same numeric recipe (bf16 MXU operands, f32 accumulate).
    N, T, H = enc_bert.shape
    enc2d = enc_bert.reshape(N * T, H).astype(jnp.bfloat16)
    proj = jnp.dot(enc2d, w_fc.astype(jnp.bfloat16),
                   preferred_element_type=jnp.float32) + b_fc
    logits = jnp.dot(proj.astype(jnp.bfloat16), out_weight.T.astype(jnp.bfloat16),
                     preferred_element_type=jnp.float32)
    return proj, logits


if __name__ == "__main__":
    key = jax.random.PRNGKey(0)
    k1, k2, k3, k4, k5 = jax.random.split(key, 5)

    # Deterministic parameter init (shapes from __init__):
    #   self.fc  = nn.Linear(768, E)    -> weight (E, 768), stored here transposed (768, E)
    #   self.out = nn.Embedding(V, E)   -> weight (V, E)
    tok_emb = 0.02 * jax.random.normal(k2, (TOK_VOCAB, H_BERT), jnp.float32)
    w_fc = 0.02 * jax.random.normal(k3, (H_BERT, E_DIM), jnp.float32)
    b_fc = 0.02 * jax.random.normal(k4, (E_DIM,), jnp.float32)
    out_weight = 0.02 * jax.random.normal(k5, (VOCAB, E_DIM), jnp.float32)

    # Two configs: tiny single tile, and multi-tile with a partial (clipped) tail block.
    for (N, T, tile_m) in [(2, 8, 2048), (2, 300, 512)]:
        kx = jax.random.fold_in(k1, N * 1000 + T)
        # x: (N, T) int token ids, as in the PyTorch module.
        x = jax.random.randint(kx, (N, T), 0, TOK_VOCAB, dtype=jnp.int32)

        # TODO(synk): the 12-layer pretrained BERT encoder is not reimplemented; a
        # deterministic token-embedding lookup stands in for encoded_layers[-1].
        enc_bert = tok_emb[x]                      # (N, T, 768)
        # TODO(synk): top_rnns bidirectional LSTM path not implemented (args.top_rnns=False).

        logits, _, y_hat, _, _, enc = jax.block_until_ready(
            net_forward(enc_bert, w_fc, b_fc, out_weight, tile_m=tile_m))

        proj_ref, logits_ref = _reference(enc_bert, w_fc, b_fc, out_weight)

        assert logits.shape == (N, T, VOCAB) and logits.dtype == jnp.bfloat16
        assert y_hat.shape == (N, T) and enc.shape == (N, T, E_DIM)
        assert bool(jnp.all((y_hat >= 0) & (y_hat < VOCAB)))
        assert jnp.allclose(enc.reshape(N * T, E_DIM), proj_ref, atol=1e-3, rtol=1e-2)
        assert jnp.allclose(logits.reshape(N * T, VOCAB).astype(jnp.float32),
                            logits_ref, atol=1e-3, rtol=2e-2)
        # y_hat is derived from the in-kernel f32 accumulator (source of truth); allow
        # disagreement with the plain-JAX argmax only on numerical near-ties.
        ref_arg = jnp.argmax(logits_ref, axis=-1).astype(jnp.int32)
        top2 = jax.lax.top_k(logits_ref, 2)[0]
        gap = top2[:, 0] - top2[:, 1]
        ok = (y_hat.reshape(-1) == ref_arg) | (gap < 1e-4)
        assert bool(jnp.all(ok))

    print("KERNEL_OK")
</pallas_src>

<mosaic_0001>
module attributes {stable_mosaic.version = 11 : i64} {
  func.func @net_kernel(%arg0: i32, %arg1: memref<16x768xf32, #tpu.memory_space<vmem>>, %arg2: memref<768x128xbf16, #tpu.memory_space<vmem>>, %arg3: memref<1x128xf32, #tpu.memory_space<vmem>>, %arg4: memref<128x512xbf16, #tpu.memory_space<vmem>>, %arg5: memref<16x512xbf16, #tpu.memory_space<vmem>>, %arg6: memref<16x1xi32, #tpu.memory_space<vmem>>, %arg7: memref<16x128xf32, #tpu.memory_space<vmem>>) attributes {dimension_semantics = [#tpu.dimension_semantics<parallel>], iteration_bounds = array<i64: 1>, scalar_prefetch = 0 : i64, scratch_operands = 0 : i64, tpu.core_type = #tpu.core_type<tc>, window_params = [{transform_indices = @transform_0, window_bounds = array<i64: 16, 768>}, {pipeline_mode = #tpu.pipeline_mode<synchronous>, transform_indices = @transform_1, window_bounds = array<i64: 768, 128>}, {pipeline_mode = #tpu.pipeline_mode<synchronous>, transform_indices = @transform_2, window_bounds = array<i64: 1, 128>}, {pipeline_mode = #tpu.pipeline_mode<synchronous>, transform_indices = @transform_3, window_bounds = array<i64: 128, 512>}, {transform_indices = @transform_4, window_bounds = array<i64: 16, 512>}, {transform_indices = @transform_5, window_bounds = array<i64: 16, 1>}, {transform_indices = @transform_6, window_bounds = array<i64: 16, 128>}]} {
    %c0 = arith.constant 0 : index
    %c0_0 = arith.constant 0 : index
    %0 = vector.load %arg1[%c0, %c0_0] : memref<16x768xf32, #tpu.memory_space<vmem>>, vector<16x768xf32>
    %1 = arith.truncf %0 : vector<16x768xf32> to vector<16x768xbf16>
    %c0_1 = arith.constant 0 : index
    %c0_2 = arith.constant 0 : index
    %2 = vector.load %arg2[%c0_1, %c0_2] : memref<768x128xbf16, #tpu.memory_space<vmem>>, vector<768x128xbf16>
    %cst = arith.constant dense<0.000000e+00> : vector<16x128xf32>
    %3 = tpu.matmul %1, %2, %cst {dimension_numbers = #tpu.dot_dimension_numbers<[1], [0], [0], [1], [0, 0, 1, 1], [], []>} : vector<16x768xbf16>, vector<768x128xbf16>, vector<16x128xf32> -> vector<16x128xf32>
    %c0_3 = arith.constant 0 : index
    %c0_4 = arith.constant 0 : index
    %4 = vector.load %arg3[%c0_3, %c0_4] : memref<1x128xf32, #tpu.memory_space<vmem>>, vector<1x128xf32>
    %5 = vector.broadcast %4 : vector<1x128xf32> to vector<16x128xf32>
    %6 = arith.addf %3, %5 : vector<16x128xf32>
    %c0_5 = arith.constant 0 : index
    %c0_6 = arith.constant 0 : index
    %7 = vector.load %arg7[%c0_5, %c0_6] : memref<16x128xf32, #tpu.memory_space<vmem>>, vector<16x128xf32>
    tpu.vector_store %arg7[%c0_5, %c0_6], %6 {strides = array<i32>} : memref<16x128xf32, #tpu.memory_space<vmem>>, vector<16x128xf32>,
    %8 = arith.truncf %6 : vector<16x128xf32> to vector<16x128xbf16>
    %c0_7 = arith.constant 0 : index
    %c0_8 = arith.constant 0 : index
    %9 = vector.load %arg4[%c0_7, %c0_8] : memref<128x512xbf16, #tpu.memory_space<vmem>>, vector<128x512xbf16>
    %cst_9 = arith.constant dense<0.000000e+00> : vector<16x512xf32>
    %10 = tpu.matmul %8, %9, %cst_9 {dimension_numbers = #tpu.dot_dimension_numbers<[1], [0], [0], [1], [0, 0, 1, 1], [], []>} : vector<16x128xbf16>, vector<128x512xbf16>, vector<16x512xf32> -> vector<16x512xf32>
    %11 = arith.truncf %10 : vector<16x512xf32> to vector<16x512xbf16>
    %c0_10 = arith.constant 0 : index
    %c0_11 = arith.constant 0 : index
    %12 = vector.load %arg5[%c0_10, %c0_11] : memref<16x512xbf16, #tpu.memory_space<vmem>>, vector<16x512xbf16>
    tpu.vector_store %arg5[%c0_10, %c0_11], %11 {strides = array<i32>} : memref<16x512xbf16, #tpu.memory_space<vmem>>, vector<16x512xbf16>,
    %13 = tpu.iota {dimensions = array<i32: 1>} : vector<1x512xi32>
    %cst_12 = arith.constant dense<0xFF800000> : vector<16xf32>
    %14 = vector.multi_reduction <maximumf>, %10, %cst_12 [1] : vector<16x512xf32> to vector<16xf32>
    %15 = vector.shape_cast %14 : vector<16xf32> to vector<16x1xf32>
    %16 = vector.broadcast %15 : vector<16x1xf32> to vector<16x512xf32>
    %17 = arith.cmpf oeq, %10, %16 : vector<16x512xf32>
    %c512_i32 = arith.constant 512 : i32
    %18 = vector.shape_cast %13 : vector<1x512xi32> to vector<1x512xi32>
    %19 = vector.broadcast %18 : vector<1x512xi32> to vector<16x512xi32>
    %20 = vector.broadcast %c512_i32 : i32 to vector<16x512xi32>
    %21 = arith.select %17, %19, %20 : vector<16x512xi1>, vector<16x512xi32>
    %cst_13 = arith.constant dense<2147483647> : vector<16xi32>
    %22 = vector.multi_reduction <minsi>, %21, %cst_13 [1] : vector<16x512xi32> to vector<16xi32>
    %23 = vector.shape_cast %22 : vector<16xi32> to vector<16x1xi32>
    %c0_14 = arith.constant 0 : index
    %c0_15 = arith.constant 0 : index
    %24 = vector.load %arg6[%c0_14, %c0_15] : memref<16x1xi32, #tpu.memory_space<vmem>>, vector<16x1xi32>
    tpu.vector_store %arg6[%c0_14, %c0_15], %23 {strides = array<i32>} : memref<16x1xi32, #tpu.memory_space<vmem>>, vector<16x1xi32>,
    return
  }
  func.func @transform_0(%arg0: i32) -> (i32, i32) {
    %c0_i32 = arith.constant 0 : i32
    %c0_i32_0 = arith.constant 0 : i32
    return %arg0, %c0_i32 : i32, i32
  }
  func.func @transform_1(%arg0: i32) -> (i32, i32) {
    %c0_i32 = arith.constant 0 : i32
    %c0_i32_0 = arith.constant 0 : i32
    %c0_i32_1 = arith.constant 0 : i32
    return %c0_i32, %c0_i32_0 : i32, i32
  }
  func.func @transform_2(%arg0: i32) -> (i32, i32) {
    %c0_i32 = arith.constant 0 : i32
    %c0_i32_0 = arith.constant 0 : i32
    %c0_i32_1 = arith.constant 0 : i32
    return %c0_i32, %c0_i32_0 : i32, i32
  }
  func.func @transform_3(%arg0: i32) -> (i32, i32) {
    %c0_i32 = arith.constant 0 : i32
    %c0_i32_0 = arith.constant 0 : i32
    %c0_i32_1 = arith.constant 0 : i32
    return %c0_i32, %c0_i32_0 : i32, i32
  }
  func.func @transform_4(%arg0: i32) -> (i32, i32) {
    %c0_i32 = arith.constant 0 : i32
    %c0_i32_0 = arith.constant 0 : i32
    return %arg0, %c0_i32 : i32, i32
  }
  func.func @transform_5(%arg0: i32) -> (i32, i32) {
    %c0_i32 = arith.constant 0 : i32
    %c0_i32_0 = arith.constant 0 : i32
    return %arg0, %c0_i32 : i32, i32
  }
  func.func @transform_6(%arg0: i32) -> (i32, i32) {
    %c0_i32 = arith.constant 0 : i32
    %c0_i32_0 = arith.constant 0 : i32
    return %arg0, %c0_i32 : i32, i32
  }
}

module attributes {stable_mosaic.version = 11 : i64} {
  func.func @net_kernel(%arg0: i32, %arg1: memref<16x768xf32, #tpu.memory_space<vmem>>, %arg2: memref<768x128xbf16, #tpu.memory_space<vmem>>, %arg3: memref<1x128xf32, #tpu.memory_space<vmem>>, %arg4: memref<128x512xbf16, #tpu.memory_space<vmem>>, %arg5: memref<16x512xbf16, #tpu.memory_space<vmem>>, %arg6: memref<16x1xi32, #tpu.memory_space<vmem>>, %arg7: memref<16x128xf32, #tpu.memory_space<vmem>>) attributes {dimension_semantics = [#tpu.dimension_semantics<parallel>], iteration_bounds = array<i64: 1>, scalar_prefetch = 0 : i64, scratch_operands = 0 : i64, tpu.core_type = #tpu.core_type<tc>, window_params = [{transform_indices = @transform_0, window_bounds = array<i64: 16, 768>}, {pipeline_mode = #tpu.pipeline_mode<synchronous>, transform_indices = @transform_1, window_bounds = array<i64: 768, 128>}, {pipeline_mode = #tpu.pipeline_mode<synchronous>, transform_indices = @transform_2, window_bounds = array<i64: 1, 128>}, {pipeline_mode = #tpu.pipeline_mode<synchronous>, transform_indices = @transform_3, window_bounds = array<i64: 128, 512>}, {transform_indices = @transform_4, window_bounds = array<i64: 16, 512>}, {transform_indices = @transform_5, window_bounds = array<i64: 16, 1>}, {transform_indices = @transform_6, window_bounds = array<i64: 16, 128>}]} {
    %c0 = arith.constant 0 : index
    %c0_0 = arith.constant 0 : index
    %0 = vector.load %arg1[%c0, %c0_0] : memref<16x768xf32, #tpu.memory_space<vmem>>, vector<16x768xf32>
    %1 = arith.truncf %0 : vector<16x768xf32> to vector<16x768xbf16>
    %c0_1 = arith.constant 0 : index
    %c0_2 = arith.constant 0 : index
    %2 = vector.load %arg2[%c0_1, %c0_2] : memref<768x128xbf16, #tpu.memory_space<vmem>>, vector<768x128xbf16>
    %cst = arith.constant dense<0.000000e+00> : vector<16x128xf32>
    %3 = tpu.matmul %1, %2, %cst {dimension_numbers = #tpu.dot_dimension_numbers<[1], [0], [0], [1], [0, 0, 1, 1], [], []>} : vector<16x768xbf16>, vector<768x128xbf16>, vector<16x128xf32> -> vector<16x128xf32>
    %c0_3 = arith.constant 0 : index
    %c0_4 = arith.constant 0 : index
    %4 = vector.load %arg3[%c0_3, %c0_4] : memref<1x128xf32, #tpu.memory_space<vmem>>, vector<1x128xf32>
    %5 = vector.broadcast %4 : vector<1x128xf32> to vector<16x128xf32>
    %6 = arith.addf %3, %5 : vector<16x128xf32>
    %c0_5 = arith.constant 0 : index
    %c0_6 = arith.constant 0 : index
    %7 = vector.load %arg7[%c0_5, %c0_6] : memref<16x128xf32, #tpu.memory_space<vmem>>, vector<16x128xf32>
    tpu.vector_store %arg7[%c0_5, %c0_6], %6 {strides = array<i32>} : memref<16x128xf32, #tpu.memory_space<vmem>>, vector<16x128xf32>,
    %8 = arith.truncf %6 : vector<16x128xf32> to vector<16x128xbf16>
    %c0_7 = arith.constant 0 : index
    %c0_8 = arith.constant 0 : index
    %9 = vector.load %arg4[%c0_7, %c0_8] : memref<128x512xbf16, #tpu.memory_space<vmem>>, vector<128x512xbf16>
    %cst_9 = arith.constant dense<0.000000e+00> : vector<16x512xf32>
    %10 = tpu.matmul %8, %9, %cst_9 {dimension_numbers = #tpu.dot_dimension_numbers<[1], [0], [0], [1], [0, 0, 1, 1], [], []>} : vector<16x128xbf16>, vector<128x512xbf16>, vector<16x512xf32> -> vector<16x512xf32>
    %11 = arith.truncf %10 : vector<16x512xf32> to vector<16x512xbf16>
    %c0_10 = arith.constant 0 : index
    %c0_11 = arith.constant 0 : index
    %12 = vector.load %arg5[%c0_10, %c0_11] : memref<16x512xbf16, #tpu.memory_space<vmem>>, vector<16x512xbf16>
    tpu.vector_store %arg5[%c0_10, %c0_11], %11 {strides = array<i32>} : memref<16x512xbf16, #tpu.memory_space<vmem>>, vector<16x512xbf16>,
    %13 = tpu.iota {dimensions = array<i32: 1>} : vector<1x512xi32>
    %cst_12 = arith.constant dense<0xFF800000> : vector<16xf32>
    %14 = vector.multi_reduction <maximumf>, %10, %cst_12 [1] : vector<16x512xf32> to vector<16xf32>
    %15 = vector.shape_cast %14 : vector<16xf32> to vector<16x1xf32>
    %16 = vector.broadcast %15 : vector<16x1xf32> to vector<16x512xf32>
    %17 = arith.cmpf oeq, %10, %16 : vector<16x512xf32>
    %c512_i32 = arith.constant 512 : i32
    %18 = vector.shape_cast %13 : vector<1x512xi32> to vector<1x512xi32>
    %19 = vector.broadcast %18 : vector<1x512xi32> to vector<16x512xi32>
    %20 = vector.broadcast %c512_i32 : i32 to vector<16x512xi32>
    %21 = arith.select %17, %19, %20 : vector<16x512xi1>, vector<16x512xi32>
    %cst_13 = arith.constant dense<2147483647> : vector<16xi32>
    %22 = vector.multi_reduction <minsi>, %21, %cst_13 [1] : vector<16x512xi32> to vector<16xi32>
    %23 = vector.shape_cast %22 : vector<16xi32> to vector<16x1xi32>
    %c0_14 = arith.constant 0 : index
    %c0_15 = arith.constant 0 : index
    %24 = vector.load %arg6[%c0_14, %c0_15] : memref<16x1xi32, #tpu.memory_space<vmem>>, vector<16x1xi32>
    tpu.vector_store %arg6[%c0_14, %c0_15], %23 {strides = array<i32>} : memref<16x1xi32, #tpu.memory_space<vmem>>, vector<16x1xi32>,
    return
  }
  func.func @transform_0(%arg0: i32) -> (i32, i32) {
    %c0_i32 = arith.constant 0 : i32
    %c0_i32_0 = arith.constant 0 : i32
    return %arg0, %c0_i32 : i32, i32
  }
  func.func @transform_1(%arg0: i32) -> (i32, i32) {
    %c0_i32 = arith.constant 0 : i32
    %c0_i32_0 = arith.constant 0 : i32
    %c0_i32_1 = arith.constant 0 : i32
    return %c0_i32, %c0_i32_0 : i32, i32
  }
  func.func @transform_2(%arg0: i32) -> (i32, i32) {
    %c0_i32 = arith.constant 0 : i32
    %c0_i32_0 = arith.constant 0 : i32
    %c0_i32_1 = arith.constant 0 : i32
    return %c0_i32, %c0_i32_0 : i32, i32
  }
  func.func @transform_3(%arg0: i32) -> (i32, i32) {
    %c0_i32 = arith.constant 0 : i32
    %c0_i32_0 = arith.constant 0 : i32
    %c0_i32_1 = arith.constant 0 : i32
    return %c0_i32, %c0_i32_0 : i32, i32
  }
  func.func @transform_4(%arg0: i32) -> (i32, i32) {
    %c0_i32 = arith.constant 0 : i32
    %c0_i32_0 = arith.constant 0 : i32
    return %arg0, %c0_i32 : i32, i32
  }
  func.func @transform_5(%arg0: i32) -> (i32, i32) {
    %c0_i32 = arith.constant 0 : i32
    %c0_i32_0 = arith.constant 0 : i32
    return %arg0, %c0_i32 : i32, i32
  }
  func.func @transform_6(%arg0: i32) -> (i32, i32) {
    %c0_i32 = arith.constant 0 : i32
    %c0_i32_0 = arith.constant 0 : i32
    return %arg0, %c0_i32 : i32, i32
  }
}

</mosaic_0001>

<bundles_post_ra>
// kernel: tpu_custom_call.1
= control target key start
LH: loop header
LB: loop body
LE: loop exit
PB: predicated region body
PF: predicated region fallthrough
CT: control target
= control target key end

     0   :  { %12 = vsyncpa [#allocation3], 0  ;;  %s1469_s0 = inlined_call_operand.hbm [shape: f32[16,768], index: 0, kind: input, shape index: {}]   ;;  %s1470_s1 = inlined_call_operand.hbm [shape: bf16[768,128], index: 1, kind: input, shape index: {}]   ;;  %s1471_s2 = inlined_call_operand.vmem [shape: f32[1,128], index: 2, kind: input, shape index: {}]   ;;  %s1472_s3 = inlined_call_operand.hbm [shape: bf16[128,512], index: 3, kind: input, shape index: {}]   ;;  %s1473_s4 = inlined_call_operand.hbm [shape: bf16[16,512], index: 4, kind: output, shape index: {0}]   ;;  %s1474_s5 = inlined_call_operand.vmem [shape: s32[16,1], index: 5, kind: output, shape index: {1}]   ;;  %s1475_s6 = inlined_call_operand.hbm [shape: f32[16,128], index: 6, kind: output, shape index: {2}]  }
   0x1   :  { %13 = vsyncpa [#allocation6], 0 }
   0x2   :  { %14 = vsyncpa [#allocation4], 0 }
   0x3   :  { %15 = vsyncpa [#allocation10], 0  ;;  %s1390_s21 = smov [#allocation5]  }
   0x4   :  { %s33_s22 = sshll.u32 %s1390_s21, 4  ;;  %s34_s22 = int_to_ptr.vmem [resolvable:$true] %s33_s22 }
   0x5   :  { %s1290_s23 = scalar_lea.vmem %s34_s22, 6144  ;;  %p1295_p1 = scmp.lt.s32.totalorder %s34_s22, %s34_s22 }
   0x6   :  { %p1291_p0 = scmp.ne.s32.totalorder %s34_s22, %s1290_s23  ;;  %p1296_p2 = scmp.lt.s32.totalorder %s1290_s23, %s1290_s23 }
   0x8   :  { %p1297_p3 = por %p1296_p2, %p1295_p1 }
   0xa   :  { %p1298_p4 = pnand %p1297_p3, %p1291_p0 }
   0xc   :  { %1301 = shalt.err (!%p1298_p4)
}
   0xd   :  { %s1391_s24 = smov 64   ;;  %s1392_s25 = smov 4  }
   0xe   :  { %39 = dma.hbm_to_vmem [thread:$0]  %s1470_s1, 6144, %s34_s22, [#allocation6], %s1391_s24, %s1391_s24, %s1392_s25  }
   0xf   :  { %s1393_s28 = smov [#allocation2]  }
  0x10   :  { %s21_s29 = sshll.u32 %s1393_s28, 4  ;;  %s22_s29 = int_to_ptr.vmem [resolvable:$true] %s21_s29 }
  0x11   :  { %s1310_s30 = scalar_lea.vmem %s22_s29, 1536  ;;  %p1315_p6 = scmp.lt.s32.totalorder %s22_s29, %s22_s29 }
  0x12   :  { %p1311_p5 = scmp.ne.s32.totalorder %s22_s29, %s1310_s30  ;;  %p1316_p7 = scmp.lt.s32.totalorder %s1310_s30, %s1310_s30 }
  0x14   :  { %p1317_p8 = por %p1316_p7, %p1315_p6 }
  0x16   :  { %p1318_p9 = pnand %p1317_p8, %p1311_p5 }
  0x18   :  { %1321 = shalt.err (!%p1318_p9)
}
  0x19   :  { %s1394_s7 = smov 768   ;;  %s1395_s8 = smov 48  }
  0x1a   :  { %27 = dma.hbm_to_vmem [thread:$0]  %s1469_s0, 1536, %s22_s29, [#allocation3], %s1394_s7, %s1394_s7, %s1395_s8  }
  0x1b   :  { %s1396_s11 = smov [#allocation7]  }
  0x1c   :  { %s47_s12 = sshll.u32 %s1396_s11, 4  ;;  %s48_s12 = int_to_ptr.vmem [resolvable:$true] %s47_s12 }
  0x1d   :  { %s1330_s1 = scalar_lea.vmem %s48_s12, 4096  ;;  %p1335_p11 = scmp.lt.s32.totalorder %s48_s12, %s48_s12 }
  0x1e   :  { %p1331_p10 = scmp.ne.s32.totalorder %s48_s12, %s1330_s1  ;;  %p1336_p12 = scmp.lt.s32.totalorder %s1330_s1, %s1330_s1 }
  0x20   :  { %p1337_p13 = por %p1336_p12, %p1335_p11 }
  0x22   :  { %p1338_p0 = pnand %p1337_p13, %p1331_p10 }
  0x24   :  { %1341 = shalt.err (!%p1338_p0)
}
  0x25   :  { %s1397_s13 = smov 256   ;;  %s1398_s14 = smov 16  }
  0x26   :  { %53 = dma.hbm_to_vmem [thread:$0]  %s1472_s3, 4096, %s48_s12, [#allocation6], %s1397_s13, %s1397_s13, %s1398_s14  }
  0x27   :  { %1382 = dma.done.wait [#allocation3], 1536  }
  0x28   :  { %1383 = vsyncadd [#allocation3], 4294965760 }
  0x29   :  { %1384 = dma.done.wait [#allocation6], 10240  }
  0x2a   :  { %1385 = vsyncadd [#allocation6], 4294957056  ;;  %v1186_v0 = vld [vmem:[#allocation5 + $0x78] sm:$0xff]   ;;  %v1190_v4 = vld [vmem:[#allocation5 + $0x70] sm:$0xff]   ;;  %s1401_s18 = smov [#allocation9]  }
  0x2b   :  { %v1187_v1 = vld [vmem:[#allocation5 + $0x38] sm:$0xff]   ;;  %1106 = vmatprep.subr.bf16.mxu0 %v1186_v0  ;;  %v1191_v5 = vld [vmem:[#allocation5 + $0x30] sm:$0xff]   ;;  %v1194_v8 = vld [vmem:[#allocation5 + $0x68] sm:$0xff]   ;;  %s998_s19 = sshll.u32 %s1401_s18, 4  ;;  %s999_s19 = int_to_ptr.vmem [resolvable:$true] %s998_s19 }
  0x2c   :  { %v1188_v2 = vld [vmem:[#allocation5 + $0xf8] sm:$0xff]   ;;  %1107 = vmatpush3.bf16.msra.mxu0 %v1187_v1  ;;  %v1192_v6 = vld [vmem:[#allocation5 + $0xf0] sm:$0xff]   ;;  %v1195_v9 = vld [vmem:[#allocation5 + $0x28] sm:$0xff]  }
  0x2d   :  { %v1189_v3 = vld [vmem:[#allocation5 + $0xb8] sm:$0xff]   ;;  %1128 = vmatprep.subr.bf16.mxu1 %v1188_v2  ;;  %1108 = vmatprep.subr.bf16.mxu0 %v1190_v4  ;;  %v1193_v7 = vld [vmem:[#allocation5 + $0xb0] sm:$0xff]   ;;  %v1196_v10 = vld [vmem:[#allocation5 + $0xe8] sm:$0xff]  }
  0x2e   :  { %1129 = vmatpush3.bf16.msra.mxu1 %v1189_v3  ;;  %v1197_v11 = vld [vmem:[#allocation5 + $0xa8] sm:$0xff]   ;;  %v1198_v12 = vld [vmem:[#allocation5 + $0x60] sm:$0xff]   ;;  %v1202_v16 = vld [vmem:[#allocation5 + $0x58] sm:$0xff]  }
  0x2f   :  { %1130 = vmatprep.subr.bf16.mxu1 %v1192_v6  ;;  %v1199_v13 = vld [vmem:[#allocation5 + $0x20] sm:$0xff]   ;;  %v1203_v17 = vld [vmem:[#allocation5 + $0x18] sm:$0xff]   ;;  %v1206_v20 = vld [vmem:[#allocation5 + $0x50] sm:$0xff]  }
  0x30   :  { %1109 = vmatpush3.bf16.msra.mxu0 %v1191_v5  ;;  %v1200_v14 = vld [vmem:[#allocation5 + $0xe0] sm:$0xff]   ;;  %v1204_v18 = vld [vmem:[#allocation5 + $0xd8] sm:$0xff]   ;;  %v1207_v21 = vld [vmem:[#allocation5 + $0x10] sm:$0xff]  }
  0x31   :  { %1110 = vmatprep.subr.bf16.mxu0 %v1194_v8  ;;  %v1201_v15 = vld [vmem:[#allocation5 + $0xa0] sm:$0xff]   ;;  %v1205_v19 = vld [vmem:[#allocation5 + $0x98] sm:$0xff]   ;;  %v1208_v22 = vld [vmem:[#allocation5 + $0xd0] sm:$0xff]  }
  0x32   :  { %1131 = vmatpush3.bf16.msra.mxu1 %v1193_v7  ;;  %v1209_v23 = vld [vmem:[#allocation5 + $0x90] sm:$0xff]   ;;  %v1210_v24 = vld [vmem:[#allocation5 + $0x48] sm:$0xff]   ;;  %v1214_v28 = vld [vmem:[#allocation5 + $0x40] sm:$0xff]  }
  0x33   :  { %1132 = vmatprep.subr.bf16.mxu1 %v1196_v10  ;;  %v1211_v25 = vld [vmem:[#allocation5 + $0x8] sm:$0xff]   ;;  %v1215_v29 = vld [vmem:[#allocation5] sm:$0xff]   ;;  %v71_v32 = vld [vmem:[#allocation2 + $0x38] sm:$0xff] }
  0x34   :  { %1111 = vmatpush3.bf16.msra.mxu0 %v1195_v9  ;;  %v1212_v26 = vld [vmem:[#allocation5 + $0xc8] sm:$0xff]   ;;  %v1216_v30 = vld [vmem:[#allocation5 + $0xc0] sm:$0xff]   ;;  %v70_v36 = vld [vmem:[#allocation2 + $0x30] sm:$0xff] }
  0x35   :  { %1112 = vmatprep.subr.bf16.mxu0 %v1198_v12  ;;  %v1213_v27 = vld [vmem:[#allocation5 + $0x88] sm:$0xff]   ;;  %v1217_v34 = vld [vmem:[#allocation5 + $0x80] sm:$0xff]   ;;  %v1218_v38 = vld [vmem:[#allocation5 + $0x178] sm:$0xff]  }
  0x36   :  { %1133 = vmatpush3.bf16.msra.mxu1 %v1197_v11  ;;  %v65_v31 = vld [vmem:[#allocation2 + $0x8] sm:$0xff]  ;;  %v64_v35 = vld [vmem:[#allocation2] sm:$0xff]  ;;  %v67_v39 = vld [vmem:[#allocation2 + $0x18] sm:$0xff] }
  0x37   :  { %1134 = vmatprep.subr.bf16.mxu1 %v1200_v14  ;;  %v77_v33 = vpack.c.bf16 %v71_v32, %v65_v31  ;;  %v76_v37 = vpack.c.bf16 %v70_v36, %v64_v35  ;;  %v73_v40 = vld [vmem:[#allocation2 + $0x48] sm:$0xff]  ;;  %v1219_v42 = vld [vmem:[#allocation5 + $0x138] sm:$0xff]   ;;  %v66_v43 = vld [vmem:[#allocation2 + $0x10] sm:$0xff] }
  0x38   :  { %1113 = vmatpush3.bf16.msra.mxu0 %v1199_v13  ;;  %v79_v41 = vpack.c.bf16 %v73_v40, %v67_v39  ;;  %v72_v44 = vld [vmem:[#allocation2 + $0x40] sm:$0xff]  ;;  %v1220_v46 = vld [vmem:[#allocation5 + $0x170] sm:$0xff]   ;;  %v1222_v48 = vld [vmem:[#allocation5 + $0x168] sm:$0xff]  }
  0x39   :  { %1114 = vmatprep.subr.bf16.mxu0 %v1202_v16  ;;  %505 = vmatprep.mubr.bf16.mxu0 %v77_v33  ;;  %v78_v45 = vpack.c.bf16 %v72_v44, %v66_v43  ;;  %v1221_v47 = vld [vmem:[#allocation5 + $0x130] sm:$0xff]   ;;  %v1223_v49 = vld [vmem:[#allocation5 + $0x128] sm:$0xff]   ;;  %v1224_v50 = vld [vmem:[#allocation5 + $0x160] sm:$0xff]  }
  0x3a   :  { %1135 = vmatpush3.bf16.msra.mxu1 %v1201_v15  ;;  %546 = vmatprep.mubr.bf16.mxu1 %v79_v41  ;;  %v1225_v51 = vld [vmem:[#allocation5 + $0x120] sm:$0xff]   ;;  %v1226_v52 = vld [vmem:[#allocation5 + $0x158] sm:$0xff]   ;;  %v1228_v54 = vld [vmem:[#allocation5 + $0x150] sm:$0xff]  }
  0x3b   :  { %1136 = vmatprep.subr.bf16.mxu1 %v1204_v18  ;;  %v1227_v53 = vld [vmem:[#allocation5 + $0x118] sm:$0xff]   ;;  %v69_v55 = vld [vmem:[#allocation2 + $0x28] sm:$0xff]  ;;  %v1229_v56 = vld [vmem:[#allocation5 + $0x110] sm:$0xff]  }
  0x3c   :  { %1115 = vmatpush3.bf16.msra.mxu0 %v1203_v17  ;;  %v75_v57 = vld [vmem:[#allocation2 + $0x58] sm:$0xff]  ;;  %v1230_v58 = vld [vmem:[#allocation5 + $0x148] sm:$0xff]   ;;  %v1232_v61 = vld [vmem:[#allocation5 + $0x140] sm:$0xff]  }
  0x3d   :  { %1116 = vmatprep.subr.bf16.mxu0 %v1206_v20  ;;  %v81_v59 = vpack.c.bf16 %v75_v57, %v69_v55  ;;  %v1231_v60 = vld [vmem:[#allocation5 + $0x108] sm:$0xff]   ;;  %v1233_v62 = vld [vmem:[#allocation5 + $0x100] sm:$0xff]   ;;  %v74_v0 = vld [vmem:[#allocation2 + $0x50] sm:$0xff] }
  0x3e   :  { %1137 = vmatpush3.bf16.msra.mxu1 %v1205_v19  ;;  %v68_v63 = vld [vmem:[#allocation2 + $0x20] sm:$0xff]  ;;  %v1237_v4 = vld [vmem:[#allocation7 + $0xe8] ss:$16 sps:$4 sm:$0xff]   ;;  %v1239_v5 = vld [vmem:[#allocation7 + $0xec] ss:$16 sps:$4 sm:$0xff]  }
  0x3f   :  { %1138 = vmatprep.subr.bf16.mxu1 %v1208_v22  ;;  %v80_v1 = vpack.c.bf16 %v74_v0, %v68_v63  ;;  %v1234_v2 = vld [vmem:[#allocation7 + $0xe0] ss:$16 sps:$4 sm:$0xff]   ;;  %v1236_v3 = vld [vmem:[#allocation7 + $0xe4] ss:$16 sps:$4 sm:$0xff]   ;;  %v1245_v7 = vld [vmem:[#allocation7 + $0xcc] ss:$16 sps:$4 sm:$0xff]  }
  0x40   :  { %1117 = vmatpush3.bf16.msra.mxu0 %v1207_v21  ;;  %v1242_v6 = vld [vmem:[#allocation7 + $0xc4] ss:$16 sps:$4 sm:$0xff]   ;;  %v1240_v8 = vld [vmem:[#allocation7 + $0xc0] ss:$16 sps:$4 sm:$0xff]   ;;  %v1243_v9 = vld [vmem:[#allocation7 + $0xc8] ss:$16 sps:$4 sm:$0xff]  }
  0x41   :  { %1118 = vmatprep.subr.bf16.mxu0 %v1210_v24  ;;  %v1248_v10 = vld [vmem:[#allocation7 + $0xa4] ss:$16 sps:$4 sm:$0xff]   ;;  %v1251_v11 = vld [vmem:[#allocation7 + $0xac] ss:$16 sps:$4 sm:$0xff]   ;;  %v1246_v12 = vld [vmem:[#allocation7 + $0xa0] ss:$16 sps:$4 sm:$0xff]  }
  0x42   :  { %1139 = vmatpush3.bf16.msra.mxu1 %v1209_v23  ;;  %v1249_v13 = vld [vmem:[#allocation7 + $0xa8] ss:$16 sps:$4 sm:$0xff]   ;;  %v1254_v14 = vld [vmem:[#allocation7 + $0x84] ss:$16 sps:$4 sm:$0xff]   ;;  %v1257_v15 = vld [vmem:[#allocation7 + $0x8c] ss:$16 sps:$4 sm:$0xff]  }
  0x43   :  { %1140 = vmatprep.subr.bf16.mxu1 %v1212_v26  ;;  %v1252_v16 = vld [vmem:[#allocation7 + $0x80] ss:$16 sps:$4 sm:$0xff]   ;;  %v1255_v17 = vld [vmem:[#allocation7 + $0x88] ss:$16 sps:$4 sm:$0xff]   ;;  %v1260_v18 = vld [vmem:[#allocation7 + $0x64] ss:$16 sps:$4 sm:$0xff]  }
  0x44   :  { %1119 = vmatpush3.bf16.msra.mxu0 %v1211_v25  ;;  %v1263_v19 = vld [vmem:[#allocation7 + $0x6c] ss:$16 sps:$4 sm:$0xff]   ;;  %v1258_v20 = vld [vmem:[#allocation7 + $0x60] ss:$16 sps:$4 sm:$0xff]   ;;  %v1261_v21 = vld [vmem:[#allocation7 + $0x68] ss:$16 sps:$4 sm:$0xff]  }
  0x45   :  { %1120 = vmatprep.subr.bf16.mxu0 %v1214_v28  ;;  %v1264_v22 = vld [vmem:[#allocation7 + $0x40] ss:$16 sps:$4 sm:$0xff]   ;;  %v1266_v23 = vld [vmem:[#allocation7 + $0x44] ss:$16 sps:$4 sm:$0xff]   ;;  %v1267_v24 = vld [vmem:[#allocation7 + $0x48] ss:$16 sps:$4 sm:$0xff]  }
  0x46   :  { %1141 = vmatpush3.bf16.msra.mxu1 %v1213_v27  ;;  %v1269_v25 = vld [vmem:[#allocation7 + $0x4c] ss:$16 sps:$4 sm:$0xff]   ;;  %v1272_v26 = vld [vmem:[#allocation7 + $0x24] ss:$16 sps:$4 sm:$0xff]   ;;  %v1270_v28 = vld [vmem:[#allocation7 + $0x20] ss:$16 sps:$4 sm:$0xff]  }
  0x47   :  { %1142 = vmatprep.subr.bf16.mxu1 %v1216_v30  ;;  %v1275_v27 = vld [vmem:[#allocation7 + $0x2c] ss:$16 sps:$4 sm:$0xff]   ;;  %v1278_v30 = vld [vmem:[#allocation7 + $0x4] ss:$16 sps:$4 sm:$0xff]   ;;  %v1276_v32 = vld [vmem:[#allocation7] ss:$16 sps:$4 sm:$0xff]  }
  0x48   :  { %1121 = vmatpush3.bf16.msra.mxu0 %v1215_v29  ;;  %v1273_v29 = vld [vmem:[#allocation7 + $0x28] ss:$16 sps:$4 sm:$0xff]   ;;  %v1281_v31 = vld [vmem:[#allocation7 + $0xc] ss:$16 sps:$4 sm:$0xff]   ;;  %v1017_v41 = vld [vmem:[%s1471_s2] ss:$0 sm:$0xff] }
  0x49   :  { %1150 = vmatprep.subr.bf16.mxu0 %v1218_v38  ;;  %v1279_v33 = vld [vmem:[#allocation7 + $0x8] ss:$16 sps:$4 sm:$0xff]   ;;  %s1400_s2 = smov [#allocation8]  }
  0x4a   :  { %1143 = vmatpush3.bf16.msra.mxu1 %v1217_v34  ;;  %v1399_v34 = vmov 0   ;;  %s984_s17 = sshll.u32 %s1400_s2, 4  ;;  %s985_s17 = int_to_ptr.vmem [resolvable:$true] %s984_s17 }
  0x4b   :  { %506 = vmatmul.mubr.bf16.vlgmr.msra.gmra.mxu0 %v76_v37  ;;  %791 = vmatprep.subr.bf16.mxu1 %v1236_v3  ;;  %s1342_s20 = scalar_lea.vmem %s985_s17, 512  ;;  %p1347_p2 = scmp.lt.s32.totalorder %s985_s17, %s985_s17 }
  0x4c   :  { %1151 = vmatpush3.bf16.msra.mxu0 %v1219_v42  ;;  %587 = vmatprep.mubr.bf16.mxu0 %v81_v59  ;;  %p1343_p1 = scmp.ne.s32.totalorder %s985_s17, %s1342_s20  ;;  %p1348_p3 = scmp.lt.s32.totalorder %s1342_s20, %s1342_s20 }
  0x4d   :  { %547 = vmatmul.mubr.bf16.vlgmr.msra.gmra.mxu1 %v78_v45  ;;  %1152 = vmatprep.subr.bf16.mxu0 %v1220_v46 }
  0x4e   :  { %792 = vmatpush1.bf16.msra.mxu1 %v1234_v2  ;;  %823 = vmatprep.mubr.bf16.mxu1 %v1399_v34  ;;  %p1349_p4 = por %p1348_p3, %p1347_p2 }
  0x4f   :  { %793 = vmatprep.subr.bf16.mxu1 %v1242_v6 }
  0x50   :  { %1153 = vmatpush3.bf16.msra.mxu0 %v1221_v47  ;;  %p1350_p5 = pnand %p1349_p4, %p1343_p1 }
  0x51   :  { %1154 = vmatprep.subr.bf16.mxu0 %v1222_v48 }
  0x52   :  { %794 = vmatpush1.bf16.msra.mxu1 %v1240_v8 }
  0x53   :  { %795 = vmatprep.subr.bf16.mxu1 %v1248_v10 }
  0x54   :  { %1155 = vmatpush3.bf16.msra.mxu0 %v1223_v49 }
  0x55   :  { %1156 = vmatprep.subr.bf16.mxu0 %v1224_v50 }
  0x56   :  { %796 = vmatpush1.bf16.msra.mxu1 %v1246_v12 }
  0x57   :  { %797 = vmatprep.subr.bf16.mxu1 %v1254_v14 }
  0x58   :  { %1157 = vmatpush3.bf16.msra.mxu0 %v1225_v51 }
  0x59   :  { %1158 = vmatprep.subr.bf16.mxu0 %v1226_v52 }
  0x5a   :  { %798 = vmatpush1.bf16.msra.mxu1 %v1252_v16 }
  0x5b   :  { %799 = vmatprep.subr.bf16.mxu1 %v1260_v18 }
  0x5c   :  { %1159 = vmatpush3.bf16.msra.mxu0 %v1227_v53 }
  0x5d   :  { %1160 = vmatprep.subr.bf16.mxu0 %v1228_v54 }
  0x5e   :  { %800 = vmatpush1.bf16.msra.mxu1 %v1258_v20 }
  0x5f   :  { %801 = vmatprep.subr.bf16.mxu1 %v1266_v23 }
  0x60   :  { %1161 = vmatpush3.bf16.msra.mxu0 %v1229_v56 }
  0x61   :  { %1162 = vmatprep.subr.bf16.mxu0 %v1230_v58 }
  0x62   :  { %802 = vmatpush1.bf16.msra.mxu1 %v1264_v22 }
  0x63   :  { %803 = vmatprep.subr.bf16.mxu1 %v1272_v26 }
  0x64   :  { %1163 = vmatpush3.bf16.msra.mxu0 %v1231_v60 }
  0x65   :  { %1164 = vmatprep.subr.bf16.mxu0 %v1232_v61 }
  0x66   :  { %804 = vmatpush1.bf16.msra.mxu1 %v1270_v28 }
  0x67   :  { %805 = vmatprep.subr.bf16.mxu1 %v1278_v30 }
  0x68   :  { %1165 = vmatpush3.bf16.msra.mxu0 %v1233_v62 }
  0x69   :  { %834 = vmatprep.subr.bf16.mxu0 %v1239_v5 }
  0x6a   :  { %806 = vmatpush1.bf16.msra.mxu1 %v1276_v32 }
  0x6b   :  { %588 = vmatmul.mubr.bf16.vlgmr.msra.gmra.mxu0 %v80_v1 }
  0x6c   :  { %835 = vmatpush1.bf16.msra.mxu0 %v1237_v4  ;;  %866 = vmatprep.mubr.bf16.mxu0 %v1399_v34 }
  0x6d   :  { %836 = vmatprep.subr.bf16.mxu0 %v1245_v7 }
  0x70   :  { %837 = vmatpush1.bf16.msra.mxu0 %v1243_v9 }
  0x71   :  { %838 = vmatprep.subr.bf16.mxu0 %v1251_v11 }
  0x74   :  { %839 = vmatpush1.bf16.msra.mxu0 %v1249_v13 }
  0x75   :  { %840 = vmatprep.subr.bf16.mxu0 %v1257_v15  ;;  %v905_v15 = vlaneseq }
  0x77   :  { %v906_v16 = vand.u32 127, %v905_v15 }
  0x78   :  { %841 = vmatpush1.bf16.msra.mxu0 %v1255_v17 }
  0x79   :  { %842 = vmatprep.subr.bf16.mxu0 %v1263_v19  ;;  %v907_v17 = vadd.s32 128, %v906_v16  ;;  %v908_v18 = vadd.s32 256, %v906_v16  ;;  %v909_v19 = vadd.s32 384, %v906_v16 }
  0x7c   :  { %843 = vmatpush1.bf16.msra.mxu0 %v1261_v21 }
  0x7d   :  { %844 = vmatprep.subr.bf16.mxu0 %v1269_v25 }
  0x80   :  { %845 = vmatpush1.bf16.msra.mxu0 %v1267_v24 }
  0x81   :  { %846 = vmatprep.subr.bf16.mxu0 %v1275_v27 }
  0x84   :  { %847 = vmatpush1.bf16.msra.mxu0 %v1273_v29 }
  0x85   :  { %848 = vmatprep.subr.bf16.mxu0 %v1281_v31 }
  0x88   :  { %849 = vmatpush1.bf16.msra.mxu0 %v1279_v33 }
 0x10b   :  { %v1122_v35 = vpop.f32.mrf.mxu0 }
 0x10d   :  { %v1123_v36 = vpop.f32.mrf.mxu0  ;;  %v1144_v37 = vpop.f32.mrf.mxu1 }
 0x10e   :  { %v1124_v40 = vadd.f32 %v1123_v36, %v1122_v35 }
 0x10f   :  { %v1125_v38 = vpop.f32.mrf.mxu0  ;;  %v1145_v39 = vpop.f32.mrf.mxu1 }
 0x110   :  { %v508_v44 = vadd.f32 %v1124_v40, %v1017_v41  ;;  %v1146_v45 = vadd.f32 %v1145_v39, %v1144_v37 }
 0x111   :  { %v1126_v42 = vpop.f32.mrf.mxu0  ;;  %v1147_v43 = vpop.f32.mrf.mxu1 }
 0x112   :  { %v1127_v46 = vadd.f32 %v1126_v42, %v1125_v38  ;;  %v549_v50 = vadd.f32 %v1146_v45, %v508_v44 }
 0x113   :  { %v1148_v47 = vpop.f32.mrf.mxu1 }
 0x114   :  { %v511_v51 = vadd.f32 %v1127_v46, %v1017_v41  ;;  %v1149_v52 = vadd.f32 %v1148_v47, %v1147_v43 }
 0x116   :  { %v552_v57 = vadd.f32 %v1149_v52, %v511_v51 }
 0x12b   :  { %v1166_v48 = vpop.f32.mrf.mxu0 }
 0x12d   :  { %v1167_v49 = vpop.f32.mrf.mxu0 }
 0x12e   :  { %v1168_v53 = vadd.f32 %v1167_v49, %v1166_v48 }
 0x12f   :  { %v1169_v54 = vpop.f32.mrf.mxu0 }
 0x130   :  { %v590_v55 = vadd.f32 %v1168_v53, %v549_v50 }
 0x131   :  { %v1170_v56 = vpop.f32.mrf.mxu0 }
 0x132   :  { %596 = vst [vmem:[#allocation9] sm:$0xff] %v590_v55  ;;  %v1171_v58 = vadd.f32 %v1170_v56, %v1169_v54 }
 0x134   :  { %v593_v59 = vadd.f32 %v1171_v58, %v552_v57 }
 0x136   :  { %597 = vst [vmem:[#allocation9 + $0x8] sm:$0xff] %v593_v59  ;;  %v598_v60 = vpack.c.bf16 %v593_v59, %v590_v55 }
 0x138   :  { %824 = vmatmul.mubr.bf16.vlgmr.msra.gmra.mxu1 %v598_v60  ;;  %867 = vmatmul.mubr.bf16.vlgmr.msra.gmra.mxu0 %v598_v60 }
 0x1f8   :  { %v825_v61 = vpop.f32.mrf.mxu1  ;;  %v868_v62 = vpop.f32.mrf.mxu0 }
 0x1f9   :  { %v910_v3 = vmax.f32 %v825_v61, %v868_v62 }
 0x1fa   :  { %v827_v63 = vpop.f32.mrf.mxu1  ;;  %v870_v0 = vpop.f32.mrf.mxu0 }
 0x1fb   :  { %v1102_v1 = vpack.c.bf16 %v827_v63, %v825_v61  ;;  %v1103_v2 = vpack.c.bf16 %v870_v0, %v868_v62  ;;  %v911_v4 = vmax.f32 %v827_v63, %v870_v0 }
 0x1fc   :  { %v829_v5 = vpop.f32.mrf.mxu1  ;;  %v872_v6 = vpop.f32.mrf.mxu0 }
 0x1fd   :  { %901 = vst [vmem:[#allocation8] sm:$0xff] %v1102_v1  ;;  %902 = vst [vmem:[#allocation8 + $0x8] sm:$0xff] %v1103_v2  ;;  %v912_v7 = vmax.f32 %v910_v3, %v911_v4  ;;  %v915_v13 = vmax.f32 %v829_v5, %v872_v6 }
 0x1fe   :  { %v831_v8 = vpop.f32.mrf.mxu1  ;;  %v874_v9 = vpop.f32.mrf.mxu0 }
 0x1ff   :  { %v1104_v10 = vpack.c.bf16 %v831_v8, %v829_v5  ;;  %v1105_v11 = vpack.c.bf16 %v874_v9, %v872_v6  ;;  %v916_v12 = vmax.f32 %v831_v8, %v874_v9  ;;  %913 = vmax.xlane.f32.xlu0 %v912_v7 }
 0x201   :  { %903 = vst [vmem:[#allocation8 + $0x10] sm:$0xff] %v1104_v10  ;;  %904 = vst [vmem:[#allocation8 + $0x18] sm:$0xff] %v1105_v11  ;;  %v917_v14 = vmax.f32 %v915_v13, %v916_v12 }
 0x203   :  { %918 = vmax.xlane.f32.xlu0 %v917_v14 }
 0x288   :  { %v914_v20 = vpop.xlane.xlu0 %913 }
 0x289   :  { %vm920_vm0 = vcmp.eq.f32.partialorder %v825_v61, %v914_v20  ;;  %vm921_vm1 = vcmp.eq.f32.partialorder %v827_v63, %v914_v20  ;;  %vm922_vm2 = vcmp.eq.f32.partialorder %v868_v62, %v914_v20  ;;  %vm923_vm3 = vcmp.eq.f32.partialorder %v870_v0, %v914_v20 }
 0x28a   :  { %v928_v21 = vsel %vm920_vm0, %v906_v16, 512  ;;  %v929_v22 = vsel %vm921_vm1, %v907_v17, 512  ;;  %v930_v23 = vsel %vm922_vm2, %v908_v18, 512  ;;  %v931_v24 = vsel %vm923_vm3, %v909_v19, 512 }
 0x28b   :  { %vm936_vm4 = vcmp.lt.s32.totalorder %v928_v21, %v930_v23  ;;  %vm938_vm5 = vcmp.lt.s32.totalorder %v929_v22, %v931_v24 }
 0x28c   :  { %v919_v25 = vpop.xlane.xlu0 %918  ;;  %v937_v26 = vsel %vm936_vm4, %v928_v21, %v930_v23  ;;  %v939_v27 = vsel %vm938_vm5, %v929_v22, %v931_v24 }
 0x28d   :  { %vm924_vm6 = vcmp.eq.f32.partialorder %v829_v5, %v919_v25  ;;  %vm925_vm7 = vcmp.eq.f32.partialorder %v831_v8, %v919_v25  ;;  %vm926_vm8 = vcmp.eq.f32.partialorder %v872_v6, %v919_v25  ;;  %vm927_vm9 = vcmp.eq.f32.partialorder %v874_v9, %v919_v25 }
 0x28e   :  { %v932_v28 = vsel %vm924_vm6, %v906_v16, 512  ;;  %v933_v29 = vsel %vm925_vm7, %v907_v17, 512  ;;  %v934_v30 = vsel %vm926_vm8, %v908_v18, 512  ;;  %v935_v31 = vsel %vm927_vm9, %v909_v19, 512 }
 0x28f   :  { %vm940_vm10 = vcmp.lt.s32.totalorder %v937_v26, %v939_v27  ;;  %vm956_vm11 = vcmp.lt.s32.totalorder %v932_v28, %v934_v30  ;;  %vm958_vm12 = vcmp.lt.s32.totalorder %v933_v29, %v935_v31 }
 0x290   :  { %v941_v32 = vsel %vm940_vm10, %v937_v26, %v939_v27  ;;  %v957_v33 = vsel %vm956_vm11, %v932_v28, %v934_v30  ;;  %v959_v34 = vsel %vm958_vm12, %v933_v29, %v935_v31 }
 0x291   :  { %v943_v35 = vshra.s32 %v941_v32, 16  ;;  %vm960_vm13 = vcmp.lt.s32.totalorder %v957_v33, %v959_v34  ;;  %v942_v40 = vand.u32 65535, %v941_v32 }
 0x292   :  { %v961_v36 = vsel %vm960_vm13, %v957_v33, %v959_v34 }
 0x293   :  { %v945_v37 = vcvt.s32.f32 %v943_v35  ;;  %v963_v38 = vshra.s32 %v961_v36, 16  ;;  %v944_v42 = vcvt.s32.f32 %v942_v40  ;;  %v962_v43 = vand.u32 65535, %v961_v36 }
 0x295   :  { %946 = vmin.xlane.f32.xlu1 %v945_v37  ;;  %v965_v39 = vcvt.s32.f32 %v963_v38  ;;  %v964_v46 = vcvt.s32.f32 %v962_v43 }
 0x299   :  { %966 = vmin.xlane.f32.xlu1 %v965_v39 }
 0x31e   :  { %v947_v41 = vpop.xlane.xlu1 %946 }
 0x31f   :  { %vm948_vm14 = vcmp.eq.f32.partialorder %v945_v37, %v947_v41 }
 0x320   :  { %v949_v44 = vsel %vm948_vm14, %v944_v42, inf }
 0x321   :  { %950 = vmin.xlane.f32.xlu0 %v949_v44 }
 0x322   :  { %v967_v45 = vpop.xlane.xlu1 %966 }
 0x323   :  { %vm968_vm15 = vcmp.eq.f32.partialorder %v965_v39, %v967_v45 }
 0x324   :  { %v969_v47 = vsel %vm968_vm15, %v964_v46, inf }
 0x325   :  { %970 = vmin.xlane.f32.xlu1 %v969_v47 }
 0x326   :  { %1353 = shalt.err (!%p1350_p5)
}
 0x327   :  { %990 = dma.vmem_to_hbm [thread:$0]  %s985_s17, 512, %s1473_s4, [#allocation4], %s1397_s13, %s1397_s13, %s1398_s14  }
 0x328   :  { %s1362_s23 = scalar_lea.vmem %s999_s19, 256  ;;  %p1367_p7 = scmp.lt.s32.totalorder %s999_s19, %s999_s19 }
 0x329   :  { %p1363_p6 = scmp.ne.s32.totalorder %s999_s19, %s1362_s23  ;;  %p1368_p8 = scmp.lt.s32.totalorder %s1362_s23, %s1362_s23 }
 0x32b   :  { %p1369_p9 = por %p1368_p8, %p1367_p7 }
 0x32d   :  { %p1370_p10 = pnand %p1369_p9, %p1363_p6 }
 0x32f   :  { %1373 = shalt.err (!%p1370_p10)
}
 0x330   :  { %s1402_s24 = smov 128   ;;  %s1403_s25 = smov 8   ;;  %v953_v48 = vcvt.f32.s32 %v947_v41  ;;  %v973_v51 = vcvt.f32.s32 %v967_v45  ;;  %vm976_vm0 = vcmask 7168  }
 0x331   :  { %1004 = dma.vmem_to_hbm [thread:$0]  %s999_s19, 256, %s1475_s6, [#allocation10], %s1402_s24, %s1402_s24, %s1403_s25  }
 0x332   :  { %v954_v50 = vshll.u32 %v953_v48, 16  ;;  %v974_v55 = vshll.u32 %v973_v51, 16 }
 0x3aa   :  { %v951_v49 = vpop.xlane.xlu0 %950 }
 0x3ab   :  { %v952_v52 = vcvt.f32.s32 %v951_v49 }
 0x3ad   :  { %v955_v53 = vadd.s32 %v954_v50, %v952_v52 }
 0x3ae   :  { %v971_v54 = vpop.xlane.xlu1 %970 }
 0x3af   :  { %977 = vst.msk [vmem:[%s1474_s5] sm:$0xff] %vm976_vm0, %v955_v53  ;;  %v972_v56 = vcvt.f32.s32 %v971_v54 }
 0x3b1   :  { %v975_v57 = vadd.s32 %v974_v55, %v972_v56 }
 0x3b3   :  { %978 = vst.msk [vmem:[%s1474_s5 + $0x8] sm:$0xff] %vm976_vm0, %v975_v57 }
 0x3b4   :  { %1386 = dma.done.wait [#allocation4], 512  }
 0x3b5   :  { %1387 = vsyncadd [#allocation4], 4294966784 }
 0x3b6   :  { %1388 = dma.done.wait [#allocation10], 256  }
 0x3b7   :  { %1389 = vsyncadd [#allocation10], 4294967040 }
 0x3b8   :  { %1013 = vsyncpa [#allocation3], 1 }
 0x3b9   :  { %1014 = vsyncpa [#allocation6], 1 }
 0x3ba   :  { %1015 = vsyncpa [#allocation4], 1 }
 0x3bb   :  { %1016 = vsyncpa [#allocation10], 1 }

// kernel: tpu_custom_call.1
= control target key start
LH: loop header
LB: loop body
LE: loop exit
PB: predicated region body
PF: predicated region fallthrough
CT: control target
= control target key end

     0   :  { %12 = vsyncpa [#allocation3], 0  ;;  %s1469_s0 = inlined_call_operand.hbm [shape: f32[16,768], index: 0, kind: input, shape index: {}]   ;;  %s1470_s1 = inlined_call_operand.hbm [shape: bf16[768,128], index: 1, kind: input, shape index: {}]   ;;  %s1471_s2 = inlined_call_operand.vmem [shape: f32[1,128], index: 2, kind: input, shape index: {}]   ;;  %s1472_s3 = inlined_call_operand.hbm [shape: bf16[128,512], index: 3, kind: input, shape index: {}]   ;;  %s1473_s4 = inlined_call_operand.hbm [shape: bf16[16,512], index: 4, kind: output, shape index: {0}]   ;;  %s1474_s5 = inlined_call_operand.vmem [shape: s32[16,1], index: 5, kind: output, shape index: {1}]   ;;  %s1475_s6 = inlined_call_operand.hbm [shape: f32[16,128], index: 6, kind: output, shape index: {2}]  }
   0x1   :  { %13 = vsyncpa [#allocation6], 0 }
   0x2   :  { %14 = vsyncpa [#allocation4], 0 }
   0x3   :  { %15 = vsyncpa [#allocation10], 0  ;;  %s1390_s21 = smov [#allocation5]  }
   0x4   :  { %s33_s22 = sshll.u32 %s1390_s21, 4  ;;  %s34_s22 = int_to_ptr.vmem [resolvable:$true] %s33_s22 }
   0x5   :  { %s1290_s23 = scalar_lea.vmem %s34_s22, 6144  ;;  %p1295_p1 = scmp.lt.s32.totalorder %s34_s22, %s34_s22 }
   0x6   :  { %p1291_p0 = scmp.ne.s32.totalorder %s34_s22, %s1290_s23  ;;  %p1296_p2 = scmp.lt.s32.totalorder %s1290_s23, %s1290_s23 }
   0x8   :  { %p1297_p3 = por %p1296_p2, %p1295_p1 }
   0xa   :  { %p1298_p4 = pnand %p1297_p3, %p1291_p0 }
   0xc   :  { %1301 = shalt.err (!%p1298_p4)
}
   0xd   :  { %s1391_s24 = smov 64   ;;  %s1392_s25 = smov 4  }
   0xe   :  { %39 = dma.hbm_to_vmem [thread:$0]  %s1470_s1, 6144, %s34_s22, [#allocation6], %s1391_s24, %s1391_s24, %s1392_s25  }
   0xf   :  { %s1393_s28 = smov [#allocation2]  }
  0x10   :  { %s21_s29 = sshll.u32 %s1393_s28, 4  ;;  %s22_s29 = int_to_ptr.vmem [resolvable:$true] %s21_s29 }
  0x11   :  { %s1310_s30 = scalar_lea.vmem %s22_s29, 1536  ;;  %p1315_p6 = scmp.lt.s32.totalorder %s22_s29, %s22_s29 }
  0x12   :  { %p1311_p5 = scmp.ne.s32.totalorder %s22_s29, %s1310_s30  ;;  %p1316_p7 = scmp.lt.s32.totalorder %s1310_s30, %s1310_s30 }
  0x14   :  { %p1317_p8 = por %p1316_p7, %p1315_p6 }
  0x16   :  { %p1318_p9 = pnand %p1317_p8, %p1311_p5 }
  0x18   :  { %1321 = shalt.err (!%p1318_p9)
}
  0x19   :  { %s1394_s7 = smov 768   ;;  %s1395_s8 = smov 48  }
  0x1a   :  { %27 = dma.hbm_to_vmem [thread:$0]  %s1469_s0, 1536, %s22_s29, [#allocation3], %s1394_s7, %s1394_s7, %s1395_s8  }
  0x1b   :  { %s1396_s11 = smov [#allocation7]  }
  0x1c   :  { %s47_s12 = sshll.u32 %s1396_s11, 4  ;;  %s48_s12 = int_to_ptr.vmem [resolvable:$true] %s47_s12 }
  0x1d   :  { %s1330_s1 = scalar_lea.vmem %s48_s12, 4096  ;;  %p1335_p11 = scmp.lt.s32.totalorder %s48_s12, %s48_s12 }
  0x1e   :  { %p1331_p10 = scmp.ne.s32.totalorder %s48_s12, %s1330_s1  ;;  %p1336_p12 = scmp.lt.s32.totalorder %s1330_s1, %s1330_s1 }
  0x20   :  { %p1337_p13 = por %p1336_p12, %p1335_p11 }
  0x22   :  { %p1338_p0 = pnand %p1337_p13, %p1331_p10 }
  0x24   :  { %1341 = shalt.err (!%p1338_p0)
}
  0x25   :  { %s1397_s13 = smov 256   ;;  %s1398_s14 = smov 16  }
  0x26   :  { %53 = dma.hbm_to_vmem [thread:$0]  %s1472_s3, 4096, %s48_s12, [#allocation6], %s1397_s13, %s1397_s13, %s1398_s14  }
  0x27   :  { %1382 = dma.done.wait [#allocation3], 1536  }
  0x28   :  { %1383 = vsyncadd [#allocation3], 4294965760 }
  0x29   :  { %1384 = dma.done.wait [#allocation6], 10240  }
  0x2a   :  { %1385 = vsyncadd [#allocation6], 4294957056  ;;  %v1186_v0 = vld [vmem:[#allocation5 + $0x78] sm:$0xff]   ;;  %v1190_v4 = vld [vmem:[#allocation5 + $0x70] sm:$0xff]   ;;  %s1401_s18 = smov [#allocation9]  }
  0x2b   :  { %v1187_v1 = vld [vmem:[#allocation5 + $0x38] sm:$0xff]   ;;  %1106 = vmatprep.subr.bf16.mxu0 %v1186_v0  ;;  %v1191_v5 = vld [vmem:[#allocation5 + $0x30] sm:$0xff]   ;;  %v1194_v8 = vld [vmem:[#allocation5 + $0x68] sm:$0xff]   ;;  %s998_s19 = sshll.u32 %s1401_s18, 4  ;;  %s999_s19 = int_to_ptr.vmem [resolvable:$true] %s998_s19 }
  0x2c   :  { %v1188_v2 = vld [vmem:[#allocation5 + $0xf8] sm:$0xff]   ;;  %1107 = vmatpush3.bf16.msra.mxu0 %v1187_v1  ;;  %v1192_v6 = vld [vmem:[#allocation5 + $0xf0] sm:$0xff]   ;;  %v1195_v9 = vld [vmem:[#allocation5 + $0x28] sm:$0xff]  }
  0x2d   :  { %v1189_v3 = vld [vmem:[#allocation5 + $0xb8] sm:$0xff]   ;;  %1128 = vmatprep.subr.bf16.mxu1 %v1188_v2  ;;  %1108 = vmatprep.subr.bf16.mxu0 %v1190_v4  ;;  %v1193_v7 = vld [vmem:[#allocation5 + $0xb0] sm:$0xff]   ;;  %v1196_v10 = vld [vmem:[#allocation5 + $0xe8] sm:$0xff]  }
  0x2e   :  { %1129 = vmatpush3.bf16.msra.mxu1 %v1189_v3  ;;  %v1197_v11 = vld [vmem:[#allocation5 + $0xa8] sm:$0xff]   ;;  %v1198_v12 = vld [vmem:[#allocation5 + $0x60] sm:$0xff]   ;;  %v1202_v16 = vld [vmem:[#allocation5 + $0x58] sm:$0xff]  }
  0x2f   :  { %1130 = vmatprep.subr.bf16.mxu1 %v1192_v6  ;;  %v1199_v13 = vld [vmem:[#allocation5 + $0x20] sm:$0xff]   ;;  %v1203_v17 = vld [vmem:[#allocation5 + $0x18] sm:$0xff]   ;;  %v1206_v20 = vld [vmem:[#allocation5 + $0x50] sm:$0xff]  }
  0x30   :  { %1109 = vmatpush3.bf16.msra.mxu0 %v1191_v5  ;;  %v1200_v14 = vld [vmem:[#allocation5 + $0xe0] sm:$0xff]   ;;  %v1204_v18 = vld [vmem:[#allocation5 + $0xd8] sm:$0xff]   ;;  %v1207_v21 = vld [vmem:[#allocation5 + $0x10] sm:$0xff]  }
  0x31   :  { %1110 = vmatprep.subr.bf16.mxu0 %v1194_v8  ;;  %v1201_v15 = vld [vmem:[#allocation5 + $0xa0] sm:$0xff]   ;;  %v1205_v19 = vld [vmem:[#allocation5 + $0x98] sm:$0xff]   ;;  %v1208_v22 = vld [vmem:[#allocation5 + $0xd0] sm:$0xff]  }
  0x32   :  { %1131 = vmatpush3.bf16.msra.mxu1 %v1193_v7  ;;  %v1209_v23 = vld [vmem:[#allocation5 + $0x90] sm:$0xff]   ;;  %v1210_v24 = vld [vmem:[#allocation5 + $0x48] sm:$0xff]   ;;  %v1214_v28 = vld [vmem:[#allocation5 + $0x40] sm:$0xff]  }
  0x33   :  { %1132 = vmatprep.subr.bf16.mxu1 %v1196_v10  ;;  %v1211_v25 = vld [vmem:[#allocation5 + $0x8] sm:$0xff]   ;;  %v1215_v29 = vld [vmem:[#allocation5] sm:$0xff]   ;;  %v71_v32 = vld [vmem:[#allocation2 + $0x38] sm:$0xff] }
  0x34   :  { %1111 = vmatpush3.bf16.msra.mxu0 %v1195_v9  ;;  %v1212_v26 = vld [vmem:[#allocation5 + $0xc8] sm:$0xff]   ;;  %v1216_v30 = vld [vmem:[#allocation5 + $0xc0] sm:$0xff]   ;;  %v70_v36 = vld [vmem:[#allocation2 + $0x30] sm:$0xff] }
  0x35   :  { %1112 = vmatprep.subr.bf16.mxu0 %v1198_v12  ;;  %v1213_v27 = vld [vmem:[#allocation5 + $0x88] sm:$0xff]   ;;  %v1217_v34 = vld [vmem:[#allocation5 + $0x80] sm:$0xff]   ;;  %v1218_v38 = vld [vmem:[#allocation5 + $0x178] sm:$0xff]  }
  0x36   :  { %1133 = vmatpush3.bf16.msra.mxu1 %v1197_v11  ;;  %v65_v31 = vld [vmem:[#allocation2 + $0x8] sm:$0xff]  ;;  %v64_v35 = vld [vmem:[#allocation2] sm:$0xff]  ;;  %v67_v39 = vld [vmem:[#allocation2 + $0x18] sm:$0xff] }
  0x37   :  { %1134 = vmatprep.subr.bf16.mxu1 %v1200_v14  ;;  %v77_v33 = vpack.c.bf16 %v71_v32, %v65_v31  ;;  %v76_v37 = vpack.c.bf16 %v70_v36, %v64_v35  ;;  %v73_v40 = vld [vmem:[#allocation2 + $0x48] sm:$0xff]  ;;  %v1219_v42 = vld [vmem:[#allocation5 + $0x138] sm:$0xff]   ;;  %v66_v43 = vld [vmem:[#allocation2 + $0x10] sm:$0xff] }
  0x38   :  { %1113 = vmatpush3.bf16.msra.mxu0 %v1199_v13  ;;  %v79_v41 = vpack.c.bf16 %v73_v40, %v67_v39  ;;  %v72_v44 = vld [vmem:[#allocation2 + $0x40] sm:$0xff]  ;;  %v1220_v46 = vld [vmem:[#allocation5 + $0x170] sm:$0xff]   ;;  %v1222_v48 = vld [vmem:[#allocation5 + $0x168] sm:$0xff]  }
  0x39   :  { %1114 = vmatprep.subr.bf16.mxu0 %v1202_v16  ;;  %505 = vmatprep.mubr.bf16.mxu0 %v77_v33  ;;  %v78_v45 = vpack.c.bf16 %v72_v44, %v66_v43  ;;  %v1221_v47 = vld [vmem:[#allocation5 + $0x130] sm:$0xff]   ;;  %v1223_v49 = vld [vmem:[#allocation5 + $0x128] sm:$0xff]   ;;  %v1224_v50 = vld [vmem:[#allocation5 + $0x160] sm:$0xff]  }
  0x3a   :  { %1135 = vmatpush3.bf16.msra.mxu1 %v1201_v15  ;;  %546 = vmatprep.mubr.bf16.mxu1 %v79_v41  ;;  %v1225_v51 = vld [vmem:[#allocation5 + $0x120] sm:$0xff]   ;;  %v1226_v52 = vld [vmem:[#allocation5 + $0x158] sm:$0xff]   ;;  %v1228_v54 = vld [vmem:[#allocation5 + $0x150] sm:$0xff]  }
  0x3b   :  { %1136 = vmatprep.subr.bf16.mxu1 %v1204_v18  ;;  %v1227_v53 = vld [vmem:[#allocation5 + $0x118] sm:$0xff]   ;;  %v69_v55 = vld [vmem:[#allocation2 + $0x28] sm:$0xff]  ;;  %v1229_v56 = vld [vmem:[#allocation5 + $0x110] sm:$0xff]  }
  0x3c   :  { %1115 = vmatpush3.bf16.msra.mxu0 %v1203_v17  ;;  %v75_v57 = vld [vmem:[#allocation2 + $0x58] sm:$0xff]  ;;  %v1230_v58 = vld [vmem:[#allocation5 + $0x148] sm:$0xff]   ;;  %v1232_v61 = vld [vmem:[#allocation5 + $0x140] sm:$0xff]  }
  0x3d   :  { %1116 = vmatprep.subr.bf16.mxu0 %v1206_v20  ;;  %v81_v59 = vpack.c.bf16 %v75_v57, %v69_v55  ;;  %v1231_v60 = vld [vmem:[#allocation5 + $0x108] sm:$0xff]   ;;  %v1233_v62 = vld [vmem:[#allocation5 + $0x100] sm:$0xff]   ;;  %v74_v0 = vld [vmem:[#allocation2 + $0x50] sm:$0xff] }
  0x3e   :  { %1137 = vmatpush3.bf16.msra.mxu1 %v1205_v19  ;;  %v68_v63 = vld [vmem:[#allocation2 + $0x20] sm:$0xff]  ;;  %v1237_v4 = vld [vmem:[#allocation7 + $0xe8] ss:$16 sps:$4 sm:$0xff]   ;;  %v1239_v5 = vld [vmem:[#allocation7 + $0xec] ss:$16 sps:$4 sm:$0xff]  }
  0x3f   :  { %1138 = vmatprep.subr.bf16.mxu1 %v1208_v22  ;;  %v80_v1 = vpack.c.bf16 %v74_v0, %v68_v63  ;;  %v1234_v2 = vld [vmem:[#allocation7 + $0xe0] ss:$16 sps:$4 sm:$0xff]   ;;  %v1236_v3 = vld [vmem:[#allocation7 + $0xe4] ss:$16 sps:$4 sm:$0xff]   ;;  %v1245_v7 = vld [vmem:[#allocation7 + $0xcc] ss:$16 sps:$4 sm:$0xff]  }
  0x40   :  { %1117 = vmatpush3.bf16.msra.mxu0 %v1207_v21  ;;  %v1242_v6 = vld [vmem:[#allocation7 + $0xc4] ss:$16 sps:$4 sm:$0xff]   ;;  %v1240_v8 = vld [vmem:[#allocation7 + $0xc0] ss:$16 sps:$4 sm:$0xff]   ;;  %v1243_v9 = vld [vmem:[#allocation7 + $0xc8] ss:$16 sps:$4 sm:$0xff]  }
  0x41   :  { %1118 = vmatprep.subr.bf16.mxu0 %v1210_v24  ;;  %v1248_v10 = vld [vmem:[#allocation7 + $0xa4] ss:$16 sps:$4 sm:$0xff]   ;;  %v1251_v11 = vld [vmem:[#allocation7 + $0xac] ss:$16 sps:$4 sm:$0xff]   ;;  %v1246_v12 = vld [vmem:[#allocation7 + $0xa0] ss:$16 sps:$4 sm:$0xff]  }
  0x42   :  { %1139 = vmatpush3.bf16.msra.mxu1 %v1209_v23  ;;  %v1249_v13 = vld [vmem:[#allocation7 + $0xa8] ss:$16 sps:$4 sm:$0xff]   ;;  %v1254_v14 = vld [vmem:[#allocation7 + $0x84] ss:$16 sps:$4 sm:$0xff]   ;;  %v1257_v15 = vld [vmem:[#allocation7 + $0x8c] ss:$16 sps:$4 sm:$0xff]  }
  0x43   :  { %1140 = vmatprep.subr.bf16.mxu1 %v1212_v26  ;;  %v1252_v16 = vld [vmem:[#allocation7 + $0x80] ss:$16 sps:$4 sm:$0xff]   ;;  %v1255_v17 = vld [vmem:[#allocation7 + $0x88] ss:$16 sps:$4 sm:$0xff]   ;;  %v1260_v18 = vld [vmem:[#allocation7 + $0x64] ss:$16 sps:$4 sm:$0xff]  }
  0x44   :  { %1119 = vmatpush3.bf16.msra.mxu0 %v1211_v25  ;;  %v1263_v19 = vld [vmem:[#allocation7 + $0x6c] ss:$16 sps:$4 sm:$0xff]   ;;  %v1258_v20 = vld [vmem:[#allocation7 + $0x60] ss:$16 sps:$4 sm:$0xff]   ;;  %v1261_v21 = vld [vmem:[#allocation7 + $0x68] ss:$16 sps:$4 sm:$0xff]  }
  0x45   :  { %1120 = vmatprep.subr.bf16.mxu0 %v1214_v28  ;;  %v1264_v22 = vld [vmem:[#allocation7 + $0x40] ss:$16 sps:$4 sm:$0xff]   ;;  %v1266_v23 = vld [vmem:[#allocation7 + $0x44] ss:$16 sps:$4 sm:$0xff]   ;;  %v1267_v24 = vld [vmem:[#allocation7 + $0x48] ss:$16 sps:$4 sm:$0xff]  }
  0x46   :  { %1141 = vmatpush3.bf16.msra.mxu1 %v1213_v27  ;;  %v1269_v25 = vld [vmem:[#allocation7 + $0x4c] ss:$16 sps:$4 sm:$0xff]   ;;  %v1272_v26 = vld [vmem:[#allocation7 + $0x24] ss:$16 sps:$4 sm:$0xff]   ;;  %v1270_v28 = vld [vmem:[#allocation7 + $0x20] ss:$16 sps:$4 sm:$0xff]  }
  0x47   :  { %1142 = vmatprep.subr.bf16.mxu1 %v1216_v30  ;;  %v1275_v27 = vld [vmem:[#allocation7 + $0x2c] ss:$16 sps:$4 sm:$0xff]   ;;  %v1278_v30 = vld [vmem:[#allocation7 + $0x4] ss:$16 sps:$4 sm:$0xff]   ;;  %v1276_v32 = vld [vmem:[#allocation7] ss:$16 sps:$4 sm:$0xff]  }
  0x48   :  { %1121 = vmatpush3.bf16.msra.mxu0 %v1215_v29  ;;  %v1273_v29 = vld [vmem:[#allocation7 + $0x28] ss:$16 sps:$4 sm:$0xff]   ;;  %v1281_v31 = vld [vmem:[#allocation7 + $0xc] ss:$16 sps:$4 sm:$0xff]   ;;  %v1017_v41 = vld [vmem:[%s1471_s2] ss:$0 sm:$0xff] }
  0x49   :  { %1150 = vmatprep.subr.bf16.mxu0 %v1218_v38  ;;  %v1279_v33 = vld [vmem:[#allocation7 + $0x8] ss:$16 sps:$4 sm:$0xff]   ;;  %s1400_s2 = smov [#allocation8]  }
  0x4a   :  { %1143 = vmatpush3.bf16.msra.mxu1 %v1217_v34  ;;  %v1399_v34 = vmov 0   ;;  %s984_s17 = sshll.u32 %s1400_s2, 4  ;;  %s985_s17 = int_to_ptr.vmem [resolvable:$true] %s984_s17 }
  0x4b   :  { %506 = vmatmul.mubr.bf16.vlgmr.msra.gmra.mxu0 %v76_v37  ;;  %791 = vmatprep.subr.bf16.mxu1 %v1236_v3  ;;  %s1342_s20 = scalar_lea.vmem %s985_s17, 512  ;;  %p1347_p2 = scmp.lt.s32.totalorder %s985_s17, %s985_s17 }
  0x4c   :  { %1151 = vmatpush3.bf16.msra.mxu0 %v1219_v42  ;;  %587 = vmatprep.mubr.bf16.mxu0 %v81_v59  ;;  %p1343_p1 = scmp.ne.s32.totalorder %s985_s17, %s1342_s20  ;;  %p1348_p3 = scmp.lt.s32.totalorder %s1342_s20, %s1342_s20 }
  0x4d   :  { %547 = vmatmul.mubr.bf16.vlgmr.msra.gmra.mxu1 %v78_v45  ;;  %1152 = vmatprep.subr.bf16.mxu0 %v1220_v46 }
  0x4e   :  { %792 = vmatpush1.bf16.msra.mxu1 %v1234_v2  ;;  %823 = vmatprep.mubr.bf16.mxu1 %v1399_v34  ;;  %p1349_p4 = por %p1348_p3, %p1347_p2 }
  0x4f   :  { %793 = vmatprep.subr.bf16.mxu1 %v1242_v6 }
  0x50   :  { %1153 = vmatpush3.bf16.msra.mxu0 %v1221_v47  ;;  %p1350_p5 = pnand %p1349_p4, %p1343_p1 }
  0x51   :  { %1154 = vmatprep.subr.bf16.mxu0 %v1222_v48 }
  0x52   :  { %794 = vmatpush1.bf16.msra.mxu1 %v1240_v8 }
  0x53   :  { %795 = vmatprep.subr.bf16.mxu1 %v1248_v10 }
  0x54   :  { %1155 = vmatpush3.bf16.msra.mxu0 %v1223_v49 }
  0x55   :  { %1156 = vmatprep.subr.bf16.mxu0 %v1224_v50 }
  0x56   :  { %796 = vmatpush1.bf16.msra.mxu1 %v1246_v12 }
  0x57   :  { %797 = vmatprep.subr.bf16.mxu1 %v1254_v14 }
  0x58   :  { %1157 = vmatpush3.bf16.msra.mxu0 %v1225_v51 }
  0x59   :  { %1158 = vmatprep.subr.bf16.mxu0 %v1226_v52 }
  0x5a   :  { %798 = vmatpush1.bf16.msra.mxu1 %v1252_v16 }
  0x5b   :  { %799 = vmatprep.subr.bf16.mxu1 %v1260_v18 }
  0x5c   :  { %1159 = vmatpush3.bf16.msra.mxu0 %v1227_v53 }
  0x5d   :  { %1160 = vmatprep.subr.bf16.mxu0 %v1228_v54 }
  0x5e   :  { %800 = vmatpush1.bf16.msra.mxu1 %v1258_v20 }
  0x5f   :  { %801 = vmatprep.subr.bf16.mxu1 %v1266_v23 }
  0x60   :  { %1161 = vmatpush3.bf16.msra.mxu0 %v1229_v56 }
  0x61   :  { %1162 = vmatprep.subr.bf16.mxu0 %v1230_v58 }
  0x62   :  { %802 = vmatpush1.bf16.msra.mxu1 %v1264_v22 }
  0x63   :  { %803 = vmatprep.subr.bf16.mxu1 %v1272_v26 }
  0x64   :  { %1163 = vmatpush3.bf16.msra.mxu0 %v1231_v60 }
  0x65   :  { %1164 = vmatprep.subr.bf16.mxu0 %v1232_v61 }
  0x66   :  { %804 = vmatpush1.bf16.msra.mxu1 %v1270_v28 }
  0x67   :  { %805 = vmatprep.subr.bf16.mxu1 %v1278_v30 }
  0x68   :  { %1165 = vmatpush3.bf16.msra.mxu0 %v1233_v62 }
  0x69   :  { %834 = vmatprep.subr.bf16.mxu0 %v1239_v5 }
  0x6a   :  { %806 = vmatpush1.bf16.msra.mxu1 %v1276_v32 }
  0x6b   :  { %588 = vmatmul.mubr.bf16.vlgmr.msra.gmra.mxu0 %v80_v1 }
  0x6c   :  { %835 = vmatpush1.bf16.msra.mxu0 %v1237_v4  ;;  %866 = vmatprep.mubr.bf16.mxu0 %v1399_v34 }
  0x6d   :  { %836 = vmatprep.subr.bf16.mxu0 %v1245_v7 }
  0x70   :  { %837 = vmatpush1.bf16.msra.mxu0 %v1243_v9 }
  0x71   :  { %838 = vmatprep.subr.bf16.mxu0 %v1251_v11 }
  0x74   :  { %839 = vmatpush1.bf16.msra.mxu0 %v1249_v13 }
  0x75   :  { %840 = vmatprep.subr.bf16.mxu0 %v1257_v15  ;;  %v905_v15 = vlaneseq }
  0x77   :  { %v906_v16 = vand.u32 127, %v905_v15 }
  0x78   :  { %841 = vmatpush1.bf16.msra.mxu0 %v1255_v17 }
  0x79   :  { %842 = vmatprep.subr.bf16.mxu0 %v1263_v19  ;;  %v907_v17 = vadd.s32 128, %v906_v16  ;;  %v908_v18 = vadd.s32 256, %v906_v16  ;;  %v909_v19 = vadd.s32 384, %v906_v16 }
  0x7c   :  { %843 = vmatpush1.bf16.msra.mxu0 %v1261_v21 }
  0x7d   :  { %844 = vmatprep.subr.bf16.mxu0 %v1269_v25 }
  0x80   :  { %845 = vmatpush1.bf16.msra.mxu0 %v1267_v24 }
  0x81   :  { %846 = vmatprep.subr.bf16.mxu0 %v1275_v27 }
  0x84   :  { %847 = vmatpush1.bf16.msra.mxu0 %v1273_v29 }
  0x85   :  { %848 = vmatprep.subr.bf16.mxu0 %v1281_v31 }
  0x88   :  { %849 = vmatpush1.bf16.msra.mxu0 %v1279_v33 }
 0x10b   :  { %v1122_v35 = vpop.f32.mrf.mxu0 }
 0x10d   :  { %v1123_v36 = vpop.f32.mrf.mxu0  ;;  %v1144_v37 = vpop.f32.mrf.mxu1 }
 0x10e   :  { %v1124_v40 = vadd.f32 %v1123_v36, %v1122_v35 }
 0x10f   :  { %v1125_v38 = vpop.f32.mrf.mxu0  ;;  %v1145_v39 = vpop.f32.mrf.mxu1 }
 0x110   :  { %v508_v44 = vadd.f32 %v1124_v40, %v1017_v41  ;;  %v1146_v45 = vadd.f32 %v1145_v39, %v1144_v37 }
 0x111   :  { %v1126_v42 = vpop.f32.mrf.mxu0  ;;  %v1147_v43 = vpop.f32.mrf.mxu1 }
 0x112   :  { %v1127_v46 = vadd.f32 %v1126_v42, %v1125_v38  ;;  %v549_v50 = vadd.f32 %v1146_v45, %v508_v44 }
 0x113   :  { %v1148_v47 = vpop.f32.mrf.mxu1 }
 0x114   :  { %v511_v51 = vadd.f32 %v1127_v46, %v1017_v41  ;;  %v1149_v52 = vadd.f32 %v1148_v47, %v1147_v43 }
 0x116   :  { %v552_v57 = vadd.f32 %v1149_v52, %v511_v51 }
 0x12b   :  { %v1166_v48 = vpop.f32.mrf.mxu0 }
 0x12d   :  { %v1167_v49 = vpop.f32.mrf.mxu0 }
 0x12e   :  { %v1168_v53 = vadd.f32 %v1167_v49, %v1166_v48 }
 0x12f   :  { %v1169_v54 = vpop.f32.mrf.mxu0 }
 0x130   :  { %v590_v55 = vadd.f32 %v1168_v53, %v549_v50 }
 0x131   :  { %v1170_v56 = vpop.f32.mrf.mxu0 }
 0x132   :  { %596 = vst [vmem:[#allocation9] sm:$0xff] %v590_v55  ;;  %v1171_v58 = vadd.f32 %v1170_v56, %v1169_v54 }
 0x134   :  { %v593_v59 = vadd.f32 %v1171_v58, %v552_v57 }
 0x136   :  { %597 = vst [vmem:[#allocation9 + $0x8] sm:$0xff] %v593_v59  ;;  %v598_v60 = vpack.c.bf16 %v593_v59, %v590_v55 }
 0x138   :  { %824 = vmatmul.mubr.bf16.vlgmr.msra.gmra.mxu1 %v598_v60  ;;  %867 = vmatmul.mubr.bf16.vlgmr.msra.gmra.mxu0 %v598_v60 }
 0x1f8   :  { %v825_v61 = vpop.f32.mrf.mxu1  ;;  %v868_v62 = vpop.f32.mrf.mxu0 }
 0x1f9   :  { %v910_v3 = vmax.f32 %v825_v61, %v868_v62 }
 0x1fa   :  { %v827_v63 = vpop.f32.mrf.mxu1  ;;  %v870_v0 = vpop.f32.mrf.mxu0 }
 0x1fb   :  { %v1102_v1 = vpack.c.bf16 %v827_v63, %v825_v61  ;;  %v1103_v2 = vpack.c.bf16 %v870_v0, %v868_v62  ;;  %v911_v4 = vmax.f32 %v827_v63, %v870_v0 }
 0x1fc   :  { %v829_v5 = vpop.f32.mrf.mxu1  ;;  %v872_v6 = vpop.f32.mrf.mxu0 }
 0x1fd   :  { %901 = vst [vmem:[#allocation8] sm:$0xff] %v1102_v1  ;;  %902 = vst [vmem:[#allocation8 + $0x8] sm:$0xff] %v1103_v2  ;;  %v912_v7 = vmax.f32 %v910_v3, %v911_v4  ;;  %v915_v13 = vmax.f32 %v829_v5, %v872_v6 }
 0x1fe   :  { %v831_v8 = vpop.f32.mrf.mxu1  ;;  %v874_v9 = vpop.f32.mrf.mxu0 }
 0x1ff   :  { %v1104_v10 = vpack.c.bf16 %v831_v8, %v829_v5  ;;  %v1105_v11 = vpack.c.bf16 %v874_v9, %v872_v6  ;;  %v916_v12 = vmax.f32 %v831_v8, %v874_v9  ;;  %913 = vmax.xlane.f32.xlu0 %v912_v7 }
 0x201   :  { %903 = vst [vmem:[#allocation8 + $0x10] sm:$0xff] %v1104_v10  ;;  %904 = vst [vmem:[#allocation8 + $0x18] sm:$0xff] %v1105_v11  ;;  %v917_v14 = vmax.f32 %v915_v13, %v916_v12 }
 0x203   :  { %918 = vmax.xlane.f32.xlu0 %v917_v14 }
 0x288   :  { %v914_v20 = vpop.xlane.xlu0 %913 }
 0x289   :  { %vm920_vm0 = vcmp.eq.f32.partialorder %v825_v61, %v914_v20  ;;  %vm921_vm1 = vcmp.eq.f32.partialorder %v827_v63, %v914_v20  ;;  %vm922_vm2 = vcmp.eq.f32.partialorder %v868_v62, %v914_v20  ;;  %vm923_vm3 = vcmp.eq.f32.partialorder %v870_v0, %v914_v20 }
 0x28a   :  { %v928_v21 = vsel %vm920_vm0, %v906_v16, 512  ;;  %v929_v22 = vsel %vm921_vm1, %v907_v17, 512  ;;  %v930_v23 = vsel %vm922_vm2, %v908_v18, 512  ;;  %v931_v24 = vsel %vm923_vm3, %v909_v19, 512 }
 0x28b   :  { %vm936_vm4 = vcmp.lt.s32.totalorder %v928_v21, %v930_v23  ;;  %vm938_vm5 = vcmp.lt.s32.totalorder %v929_v22, %v931_v24 }
 0x28c   :  { %v919_v25 = vpop.xlane.xlu0 %918  ;;  %v937_v26 = vsel %vm936_vm4, %v928_v21, %v930_v23  ;;  %v939_v27 = vsel %vm938_vm5, %v929_v22, %v931_v24 }
 0x28d   :  { %vm924_vm6 = vcmp.eq.f32.partialorder %v829_v5, %v919_v25  ;;  %vm925_vm7 = vcmp.eq.f32.partialorder %v831_v8, %v919_v25  ;;  %vm926_vm8 = vcmp.eq.f32.partialorder %v872_v6, %v919_v25  ;;  %vm927_vm9 = vcmp.eq.f32.partialorder %v874_v9, %v919_v25 }
 0x28e   :  { %v932_v28 = vsel %vm924_vm6, %v906_v16, 512  ;;  %v933_v29 = vsel %vm925_vm7, %v907_v17, 512  ;;  %v934_v30 = vsel %vm926_vm8, %v908_v18, 512  ;;  %v935_v31 = vsel %vm927_vm9, %v909_v19, 512 }
 0x28f   :  { %vm940_vm10 = vcmp.lt.s32.totalorder %v937_v26, %v939_v27  ;;  %vm956_vm11 = vcmp.lt.s32.totalorder %v932_v28, %v934_v30  ;;  %vm958_vm12 = vcmp.lt.s32.totalorder %v933_v29, %v935_v31 }
 0x290   :  { %v941_v32 = vsel %vm940_vm10, %v937_v26, %v939_v27  ;;  %v957_v33 = vsel %vm956_vm11, %v932_v28, %v934_v30  ;;  %v959_v34 = vsel %vm958_vm12, %v933_v29, %v935_v31 }
 0x291   :  { %v943_v35 = vshra.s32 %v941_v32, 16  ;;  %vm960_vm13 = vcmp.lt.s32.totalorder %v957_v33, %v959_v34  ;;  %v942_v40 = vand.u32 65535, %v941_v32 }
 0x292   :  { %v961_v36 = vsel %vm960_vm13, %v957_v33, %v959_v34 }
 0x293   :  { %v945_v37 = vcvt.s32.f32 %v943_v35  ;;  %v963_v38 = vshra.s32 %v961_v36, 16  ;;  %v944_v42 = vcvt.s32.f32 %v942_v40  ;;  %v962_v43 = vand.u32 65535, %v961_v36 }
 0x295   :  { %946 = vmin.xlane.f32.xlu1 %v945_v37  ;;  %v965_v39 = vcvt.s32.f32 %v963_v38  ;;  %v964_v46 = vcvt.s32.f32 %v962_v43 }
 0x299   :  { %966 = vmin.xlane.f32.xlu1 %v965_v39 }
 0x31e   :  { %v947_v41 = vpop.xlane.xlu1 %946 }
 0x31f   :  { %vm948_vm14 = vcmp.eq.f32.partialorder %v945_v37, %v947_v41 }
 0x320   :  { %v949_v44 = vsel %vm948_vm14, %v944_v42, inf }
 0x321   :  { %950 = vmin.xlane.f32.xlu0 %v949_v44 }
 0x322   :  { %v967_v45 = vpop.xlane.xlu1 %966 }
 0x323   :  { %vm968_vm15 = vcmp.eq.f32.partialorder %v965_v39, %v967_v45 }
 0x324   :  { %v969_v47 = vsel %vm968_vm15, %v964_v46, inf }
 0x325   :  { %970 = vmin.xlane.f32.xlu1 %v969_v47 }
 0x326   :  { %1353 = shalt.err (!%p1350_p5)
}
 0x327   :  { %990 = dma.vmem_to_hbm [thread:$0]  %s985_s17, 512, %s1473_s4, [#allocation4], %s1397_s13, %s1397_s13, %s1398_s14  }
 0x328   :  { %s1362_s23 = scalar_lea.vmem %s999_s19, 256  ;;  %p1367_p7 = scmp.lt.s32.totalorder %s999_s19, %s999_s19 }
 0x329   :  { %p1363_p6 = scmp.ne.s32.totalorder %s999_s19, %s1362_s23  ;;  %p1368_p8 = scmp.lt.s32.totalorder %s1362_s23, %s1362_s23 }
 0x32b   :  { %p1369_p9 = por %p1368_p8, %p1367_p7 }
 0x32d   :  { %p1370_p10 = pnand %p1369_p9, %p1363_p6 }
 0x32f   :  { %1373 = shalt.err (!%p1370_p10)
}
 0x330   :  { %s1402_s24 = smov 128   ;;  %s1403_s25 = smov 8   ;;  %v953_v48 = vcvt.f32.s32 %v947_v41  ;;  %v973_v51 = vcvt.f32.s32 %v967_v45  ;;  %vm976_vm0 = vcmask 7168  }
 0x331   :  { %1004 = dma.vmem_to_hbm [thread:$0]  %s999_s19, 256, %s1475_s6, [#allocation10], %s1402_s24, %s1402_s24, %s1403_s25  }
 0x332   :  { %v954_v50 = vshll.u32 %v953_v48, 16  ;;  %v974_v55 = vshll.u32 %v973_v51, 16 }
 0x3aa   :  { %v951_v49 = vpop.xlane.xlu0 %950 }
 0x3ab   :  { %v952_v52 = vcvt.f32.s32 %v951_v49 }
 0x3ad   :  { %v955_v53 = vadd.s32 %v954_v50, %v952_v52 }
 0x3ae   :  { %v971_v54 = vpop.xlane.xlu1 %970 }
 0x3af   :  { %977 = vst.msk [vmem:[%s1474_s5] sm:$0xff] %vm976_vm0, %v955_v53  ;;  %v972_v56 = vcvt.f32.s32 %v971_v54 }
 0x3b1   :  { %v975_v57 = vadd.s32 %v974_v55, %v972_v56 }
 0x3b3   :  { %978 = vst.msk [vmem:[%s1474_s5 + $0x8] sm:$0xff] %vm976_vm0, %v975_v57 }
 0x3b4   :  { %1386 = dma.done.wait [#allocation4], 512  }
 0x3b5   :  { %1387 = vsyncadd [#allocation4], 4294966784 }
 0x3b6   :  { %1388 = dma.done.wait [#allocation10], 256  }
 0x3b7   :  { %1389 = vsyncadd [#allocation10], 4294967040 }
 0x3b8   :  { %1013 = vsyncpa [#allocation3], 1 }
 0x3b9   :  { %1014 = vsyncpa [#allocation6], 1 }
 0x3ba   :  { %1015 = vsyncpa [#allocation4], 1 }
 0x3bb   :  { %1016 = vsyncpa [#allocation10], 1 }

</bundles_post_ra>
